<compile_context>
chip_gen: v7x
topology: tpu7x:2x2x1
jax: 0.10.0
libtpu: 0.0.40
codegen_flags: <defaults>
</compile_context>

<pallas_src>
import math

import jax
import jax.numpy as jnp
from jax.experimental import pallas as pl
from jax.experimental.pallas import tpu as pltpu

# ---- module hyper-parameters (match the PyTorch module) ----
HIDDEN_DIM = 32        # hidden_dim
ATTENTION_HIDDEN = 12  # attention_hidden
LINEAR1_LEN = 16       # linear1_len
BATCH = 1              # batch_size (module only supports 1)
EMBED_LEN = 16         # embed_len
INPUT_LEN = 16         # input_size (LSTMCell input dim)
OUTPUT_SIZE = 10       # output_size (vocab)
SEQ = 8                # number of encoder words in x
T_STEPS = 5            # wordcount (len of true_outputs per sentence)

OUT_LANES = 128                            # lane-dense output slab width
OUT_ROWS = ((T_STEPS + 7) // 8) * 8        # pad rows to a full (8,128) tile

# packed-operand layout
_DATA_ROWS = 24        # rows 0..7 lstm_in (T real), 8..15 u_t (T real), 16..23 x
_W_ROWS = 96           # rows 0..15 [W_ih|W1a_x], 16..47 [W_hh|W1a_h], 48..95 wp_fold_ext
_W_LANES = 256
_B_ROWS = 8            # row0 b_lstm, row1 b1a, row2 b_fold(+mask), row3 wx, row4 w2a, row5 b2a


def _lstm_attention_kernel(
    data_ref,   # (24, 16)   [lstm_in pad8 ; u_t pad8 ; x]
    w_ref,      # (96, 256)  packed weights (see _W_ROWS layout)
    b_ref,      # (8, 128)   packed biases / row vectors
    out_ref,    # (OUT_ROWS, 128)  row t: lanes 0..V-1 pvocab, lane V p_gen
):
    H, V, A = HIDDEN_DIM, OUTPUT_SIZE, ATTENTION_HIDDEN
    I, T = INPUT_LEN, T_STEPS

    data = data_ref[...]                                    # (24, 16)
    w_in = w_ref[0:16, :]                                   # (16, 256)  [W_ih | W1a_x]
    w_h = w_ref[16:48, :]                                   # (32, 256)  [W_hh | W1a_h]
    wp = w_ref[48:96, 0:128]                                # (48, 128)  folded prob-gen (+pgen col V)

    b_lstm = b_ref[0:1, :]                                  # (1, 128)
    b1a = b_ref[1:2, 0:A]                                   # (1, A)
    b_fold = b_ref[2:3, :]                                  # (1, 128)  lanes >= V are -1e30
    wx_row = b_ref[3:4, 0:I]                                # (1, I)
    w2a_row = b_ref[4:5, 0:A]                               # (1, A)
    b2a = b_ref[5:6, 0:1]                                   # (1, 1)

    x = data[16:24, :]                                      # (S, E) encoder words
    u_rows = data[8:16, :]                                  # (8, I) per-step u_t (T real rows)

    # ---- hoisted, time-invariant projections: one batched MXU pass ----
    big = jnp.dot(data, w_in, preferred_element_type=jnp.float32)   # (24, 256)
    pre_gates = big[0:8, 0:128] + b_lstm                             # rows 0..T-1: x_t @ W_ih + b
    att_x = big[16:24, 128:128 + A] + b1a                            # (S, A) encoder attention proj
    ux_all = jnp.sum(u_rows * wx_row, axis=-1, keepdims=True)        # (8, 1)  u_t . wx

    lane = jax.lax.broadcasted_iota(jnp.int32, (1, OUT_LANES), 1)
    onehot_v = (lane == V).astype(jnp.float32)

    h = jnp.zeros((1, H), jnp.float32)
    c = jnp.zeros((1, H), jnp.float32)
    rows = []

    # T is small and static: fully unrolled straight-line recurrence, h/c in vregs.
    for t in range(T):
        # ---- single h-dependent MXU pass: lanes 0..127 = h@W_hh, 128..139 = h@W1a_h ----
        hf = jnp.dot(h, w_h, preferred_element_type=jnp.float32)    # (1, 256)
        att_h = hf[:, 128:128 + A]                                   # (1, A)
        gates = pre_gates[t:t + 1, :] + hf[:, 0:128]                 # (1, 4H)

        # ---- additive attention over the S encoder words (layer-2 N=1 on the VPU) ----
        a1 = att_x + att_h                                           # (S, A)
        a1 = jnp.where(a1 > 0, a1, 0.01 * a1)                        # LeakyReLU(0.01)
        e = jnp.sum(a1 * w2a_row, axis=-1, keepdims=True) + b2a      # (S, 1)
        denom = jnp.sum(e, axis=0, keepdims=True)                    # (1, 1)
        alpha = e / denom                     # plain e/sum(e), faithful to the module
        c_i = jnp.sum(alpha * x, axis=0, keepdims=True)              # (1, E) context

        # ---- LSTMCell: whole-vreg activations, then lane-range selects ----
        sig_all = jax.nn.sigmoid(gates)
        tanh_all = jnp.tanh(gates)
        i_g = sig_all[:, 0:H]
        f_g = sig_all[:, H:2 * H]
        g_g = tanh_all[:, 2 * H:3 * H]
        o_g = sig_all[:, 3 * H:4 * H]
        c = f_g * c + i_g * g_g
        h = o_g * jnp.tanh(c)

        # ---- folded prob-gen (+ p_gen column V) in one MXU pass ----
        hc = jnp.concatenate([h, c_i], axis=-1)                      # (1, H+E)
        p2_raw = jnp.dot(hc, wp, preferred_element_type=jnp.float32)  # (1, 128)
        pgen = jax.nn.sigmoid(p2_raw[:, V:V + 1] + ux_all[t:t + 1, :])  # (1, 1)

        p2 = p2_raw + b_fold                                          # lanes >= V -> ~-1e30
        m = jnp.max(p2, axis=-1, keepdims=True)
        ex = jnp.exp(p2 - m)                                          # masked lanes -> exactly 0
        pvocab = ex / jnp.sum(ex, axis=-1, keepdims=True)             # exact divide (parity)

        # pvocab lanes >= V are already 0, so one add packs p_gen into lane V
        rows.append(pvocab + pgen * onehot_v)

    if OUT_ROWS > T:
        rows.append(jnp.zeros((OUT_ROWS - T, OUT_LANES), jnp.float32))
    out_ref[...] = jnp.concatenate(rows, axis=0)          # single dense (8,128) store


def init_params(key):
    H, E, I = HIDDEN_DIM, EMBED_LEN, INPUT_LEN
    A, L1, V = ATTENTION_HIDDEN, LINEAR1_LEN, OUTPUT_SIZE
    ks = jax.random.split(key, 16)

    def u(k, shape, scale=0.1):
        return jax.random.uniform(k, shape, jnp.float32, -scale, scale)

    return dict(
        w1a_h=u(ks[0], (H, A)), w1a_x=u(ks[1], (E, A)), b1a=u(ks[2], (1, A)),
        w2a=u(ks[3], (A, 1)), b2a=u(ks[4], (1, 1)),
        wih=u(ks[5], (I, 4 * H)), whh=u(ks[6], (H, 4 * H)), blstm=u(ks[7], (1, 4 * H)),
        wp1_h=u(ks[8], (H, L1)), wp1_c=u(ks[9], (E, L1)), bp1=u(ks[10], (1, L1)),
        wp2=u(ks[11], (L1, V)), bp2=u(ks[12], (1, V)),
        wh=jax.random.uniform(ks[13], (E, 1), jnp.float32),
        ws=jax.random.uniform(ks[14], (H, 1), jnp.float32),
        wx=jax.random.uniform(ks[15], (I, 1), jnp.float32),
    )


def pack_params(params):
    """One-time weight packing (outside the per-call path)."""
    A, V, I = ATTENTION_HIDDEN, OUTPUT_SIZE, INPUT_LEN

    # fold the two prob-gen linears (no activation between them in the module)
    wp1 = jnp.concatenate([params["wp1_h"], params["wp1_c"]], axis=0)        # (H+E, L1)
    wp_fold = wp1 @ params["wp2"]                                            # (H+E, V)
    b_fold_vocab = params["bp1"] @ params["wp2"] + params["bp2"]             # (1, V)
    # extra p_gen column, ordered to match hc = [h ; c_i]
    pg_col = jnp.concatenate([params["ws"][:, 0], params["wh"][:, 0]], axis=0)  # (H+E,)

    w_all = jnp.zeros((_W_ROWS, _W_LANES), jnp.float32)
    w_all = w_all.at[0:16, 0:128].set(params["wih"])
    w_all = w_all.at[0:16, 128:128 + A].set(params["w1a_x"])
    w_all = w_all.at[16:48, 0:128].set(params["whh"])
    w_all = w_all.at[16:48, 128:128 + A].set(params["w1a_h"])
    w_all = w_all.at[48:96, 0:V].set(wp_fold)
    w_all = w_all.at[48:96, V].set(pg_col)

    b_all = jnp.zeros((_B_ROWS, OUT_LANES), jnp.float32)
    b_all = b_all.at[0, :].set(params["blstm"][0])
    b_all = b_all.at[1, 0:A].set(params["b1a"][0])
    b_all = b_all.at[2, :].set(jnp.full((OUT_LANES,), -1e30, jnp.float32))
    b_all = b_all.at[2, 0:V].set(b_fold_vocab[0])
    b_all = b_all.at[3, 0:I].set(params["wx"][:, 0])
    b_all = b_all.at[4, 0:A].set(params["w2a"][:, 0])
    b_all = b_all.at[5, 0].set(params["b2a"][0, 0])
    return w_all, b_all


def _run_kernel(data, w_all, b_all):
    def cspec(shape):
        return pl.BlockSpec(shape, lambda i: (0,) * len(shape))

    return pl.pallas_call(
        _lstm_attention_kernel,
        out_shape=jax.ShapeDtypeStruct((OUT_ROWS, OUT_LANES), jnp.float32),
        grid_spec=pltpu.PrefetchScalarGridSpec(
            num_scalar_prefetch=0,
            grid=(1,),              # single invocation; recurrence unrolled in-kernel
            in_specs=[cspec((_DATA_ROWS, INPUT_LEN)),
                      cspec((_W_ROWS, _W_LANES)),
                      cspec((_B_ROWS, OUT_LANES))],
            out_specs=cspec((OUT_ROWS, OUT_LANES)),
        ),
        compiler_params=pltpu.CompilerParams(dimension_semantics=("arbitrary",)),
    )(data, w_all, b_all)


@jax.jit
def _forward_jit(x, true_outputs, true_word, w_all, b_all, key):
    B = x.shape[0]
    T, I, V = T_STEPS, INPUT_LEN, OUTPUT_SIZE

    x_se = x[0].astype(jnp.float32)                          # (S, E)   (batch == 1)
    trans_out = true_outputs[0].astype(jnp.float32)          # (T, I)

    # TODO(synk): torch.rand() calls inside forward are not bit-reproducible;
    # replaced with deterministic jax.random draws of the same shapes.
    k1, k2 = jax.random.split(key)
    lstm_in0 = jax.random.uniform(k1, (1, I), dtype=jnp.float32)      # time_step == 0
    lstm_in_seq = jnp.concatenate([lstm_in0, trans_out[1:]], axis=0)  # (T, I) teacher forcing
    u_t_seq = jax.random.uniform(k2, (T, I), dtype=jnp.float32)       # (T, I)

    # per-call data slab: rows 0..7 lstm_in, 8..15 u_t, 16..23 encoder words
    lstm_pad = jnp.zeros((8, I), jnp.float32).at[0:T, :].set(lstm_in_seq)
    u_pad = jnp.zeros((8, I), jnp.float32).at[0:T, :].set(u_t_seq)
    data = jnp.concatenate([lstm_pad, u_pad, x_se], axis=0)           # (24, I)

    slab = _run_kernel(data, w_all, b_all)
    pvocab_seq = slab[:T, :V]                                # (T, V)
    pgen_seq = slab[:T, V:V + 1]                             # (T, 1)

    # torch.argmax(pvocab, dim=0): argmax over the size-1 batch axis (module quirk)
    outputs = jnp.argmax(pvocab_seq[:, None, :], axis=1)     # (T, V) of zeros
    outputs = jnp.transpose(outputs, (1, 0))                 # (V, T)

    # in-graph NLL bookkeeping (replaces host-side device_get + python loop)
    w = true_word[0]                                         # (T,) int
    valid = (w >= 0) & (w < V)
    w_safe = jnp.clip(w, 0, V - 1)
    p = jnp.take_along_axis(pvocab_seq, w_safe[:, None], axis=1)[:, 0]     # (T,)
    contrib = jnp.where(valid & (p > 0), -jnp.log(jnp.maximum(p, 1e-30)), 0.0)
    total_loss = jnp.sum(contrib) / B

    return outputs, total_loss, pgen_seq


def lstm_attention_forward(x, true_outputs, true_word, w_all, b_all, key):
    """x: (1,S,E); true_outputs: (1,T,I); true_word: (1,T) ints; packed weights."""
    x = jnp.asarray(x, jnp.float32)
    assert x.shape[0] == BATCH == 1, "module semantics only defined for batch_size == 1"
    assert x.shape[1] == SEQ and x.shape[2] == EMBED_LEN
    tw = jnp.asarray(true_word, dtype=jnp.int32)
    return _forward_jit(x, jnp.asarray(true_outputs, jnp.float32), tw, w_all, b_all, key)


if __name__ == "__main__":
    root = jax.random.PRNGKey(0)
    k_params, k_x, k_true, k_word, k_fwd = jax.random.split(root, 5)

    params = init_params(k_params)
    w_all, b_all = pack_params(params)          # one-time packing, outside the jit path
    w_all = jax.device_put(w_all)
    b_all = jax.device_put(b_all)

    x = jax.random.uniform(k_x, (BATCH, SEQ, EMBED_LEN), dtype=jnp.float32)
    true_outputs = jax.random.uniform(k_true, (BATCH, T_STEPS, INPUT_LEN), dtype=jnp.float32)
    true_word = jax.random.randint(k_word, (BATCH, T_STEPS), 0, OUTPUT_SIZE)

    outputs, total_loss, pgen = lstm_attention_forward(
        x, true_outputs, true_word, w_all, b_all, k_fwd)
    outputs = jax.block_until_ready(outputs)
    total_loss = jax.block_until_ready(total_loss)
    pgen = jax.block_until_ready(pgen)

    assert outputs.shape == (OUTPUT_SIZE, T_STEPS)
    assert pgen.shape == (T_STEPS, 1)
    assert math.isfinite(float(total_loss))
    print("KERNEL_OK")
</pallas_src>

<mosaic_0001>
module attributes {stable_mosaic.version = 11 : i64} {
  func.func @_lstm_attention_kernel(%arg0: i32, %arg1: memref<24x16xf32, #tpu.memory_space<vmem>>, %arg2: memref<96x256xf32, #tpu.memory_space<vmem>>, %arg3: memref<8x128xf32, #tpu.memory_space<vmem>>, %arg4: memref<8x128xf32, #tpu.memory_space<vmem>>) attributes {dimension_semantics = [#tpu.dimension_semantics<arbitrary>], iteration_bounds = array<i64: 1>, scalar_prefetch = 0 : i64, scratch_operands = 0 : i64, tpu.core_type = #tpu.core_type<tc>, window_params = [{pipeline_mode = #tpu.pipeline_mode<synchronous>, transform_indices = @transform_0, window_bounds = array<i64: 24, 16>}, {pipeline_mode = #tpu.pipeline_mode<synchronous>, transform_indices = @transform_1, window_bounds = array<i64: 96, 256>}, {pipeline_mode = #tpu.pipeline_mode<synchronous>, transform_indices = @transform_2, window_bounds = array<i64: 8, 128>}, {pipeline_mode = #tpu.pipeline_mode<synchronous>, transform_indices = @transform_3, window_bounds = array<i64: 8, 128>}]} {
    %c0 = arith.constant 0 : index
    %c0_0 = arith.constant 0 : index
    %0 = vector.load %arg1[%c0, %c0_0] : memref<24x16xf32, #tpu.memory_space<vmem>>, vector<24x16xf32>
    %c0_1 = arith.constant 0 : index
    %c0_2 = arith.constant 0 : index
    %1 = vector.load %arg2[%c0_1, %c0_2] : memref<96x256xf32, #tpu.memory_space<vmem>>, vector<16x256xf32>
    %c16 = arith.constant 16 : index
    %c0_3 = arith.constant 0 : index
    %2 = vector.load %arg2[%c16, %c0_3] : memref<96x256xf32, #tpu.memory_space<vmem>>, vector<32x256xf32>
    %c48 = arith.constant 48 : index
    %c0_4 = arith.constant 0 : index
    %3 = vector.load %arg2[%c48, %c0_4] : memref<96x256xf32, #tpu.memory_space<vmem>>, vector<48x128xf32>
    %c0_5 = arith.constant 0 : index
    %c0_6 = arith.constant 0 : index
    %4 = vector.load %arg3[%c0_5, %c0_6] : memref<8x128xf32, #tpu.memory_space<vmem>>, vector<1x128xf32>
    %c1 = arith.constant 1 : index
    %c0_7 = arith.constant 0 : index
    %5 = vector.load %arg3[%c1, %c0_7] : memref<8x128xf32, #tpu.memory_space<vmem>>, vector<1x12xf32>
    %c2 = arith.constant 2 : index
    %c0_8 = arith.constant 0 : index
    %6 = vector.load %arg3[%c2, %c0_8] : memref<8x128xf32, #tpu.memory_space<vmem>>, vector<1x128xf32>
    %c3 = arith.constant 3 : index
    %c0_9 = arith.constant 0 : index
    %7 = vector.load %arg3[%c3, %c0_9] : memref<8x128xf32, #tpu.memory_space<vmem>>, vector<1x16xf32>
    %c4 = arith.constant 4 : index
    %c0_10 = arith.constant 0 : index
    %8 = vector.load %arg3[%c4, %c0_10] : memref<8x128xf32, #tpu.memory_space<vmem>>, vector<1x12xf32>
    %c5 = arith.constant 5 : index
    %c0_11 = arith.constant 0 : index
    %9 = vector.load %arg3[%c5, %c0_11] : memref<8x128xf32, #tpu.memory_space<vmem>>, vector<1x1xf32>
    %10 = vector.extract_strided_slice %0 {offsets = [16, 0], sizes = [8, 16], strides = [1, 1]} : vector<24x16xf32> to vector<8x16xf32>
    %11 = vector.extract_strided_slice %0 {offsets = [8, 0], sizes = [8, 16], strides = [1, 1]} : vector<24x16xf32> to vector<8x16xf32>
    %cst = arith.constant dense<0.000000e+00> : vector<24x256xf32>
    %12 = tpu.matmul %0, %1, %cst {dimension_numbers = #tpu.dot_dimension_numbers<[1], [0], [0], [1], [0, 0, 1, 1], [], []>} : vector<24x16xf32>, vector<16x256xf32>, vector<24x256xf32> -> vector<24x256xf32>
    %13 = vector.extract_strided_slice %12 {offsets = [0, 0], sizes = [8, 128], strides = [1, 1]} : vector<24x256xf32> to vector<8x128xf32>
    %14 = vector.broadcast %4 : vector<1x128xf32> to vector<8x128xf32>
    %15 = arith.addf %13, %14 : vector<8x128xf32>
    %16 = vector.extract_strided_slice %12 {offsets = [16, 128], sizes = [8, 12], strides = [1, 1]} : vector<24x256xf32> to vector<8x12xf32>
    %17 = vector.broadcast %5 : vector<1x12xf32> to vector<8x12xf32>
    %18 = arith.addf %16, %17 : vector<8x12xf32>
    %19 = vector.broadcast %7 : vector<1x16xf32> to vector<8x16xf32>
    %20 = arith.mulf %11, %19 : vector<8x16xf32>
    %cst_12 = arith.constant dense<0.000000e+00> : vector<8xf32>
    %21 = vector.multi_reduction <add>, %20, %cst_12 [1] : vector<8x16xf32> to vector<8xf32>
    %22 = vector.shape_cast %21 : vector<8xf32> to vector<8x1xf32>
    %23 = tpu.iota {dimensions = array<i32: 1>} : vector<1x128xi32>
    %c10_i32 = arith.constant 10 : i32
    %24 = vector.broadcast %c10_i32 : i32 to vector<1x128xi32>
    %25 = arith.cmpi eq, %23, %24 : vector<1x128xi32>
    %26 = arith.extui %25 : vector<1x128xi1> to vector<1x128xi32>
    %27 = arith.sitofp %26 : vector<1x128xi32> to vector<1x128xf32>
    %cst_13 = arith.constant 0.000000e+00 : f32
    %28 = vector.broadcast %cst_13 : f32 to vector<1x32xf32>
    %cst_14 = arith.constant 0.000000e+00 : f32
    %29 = vector.broadcast %cst_14 : f32 to vector<1x32xf32>
    %cst_15 = arith.constant dense<0.000000e+00> : vector<1x256xf32>
    %30 = tpu.matmul %28, %2, %cst_15 {dimension_numbers = #tpu.dot_dimension_numbers<[1], [0], [0], [1], [0, 0, 1, 1], [], []>} : vector<1x32xf32>, vector<32x256xf32>, vector<1x256xf32> -> vector<1x256xf32>
    %31 = vector.extract_strided_slice %30 {offsets = [0, 128], sizes = [1, 12], strides = [1, 1]} : vector<1x256xf32> to vector<1x12xf32>
    %32 = vector.extract_strided_slice %15 {offsets = [0, 0], sizes = [1, 128], strides = [1, 1]} : vector<8x128xf32> to vector<1x128xf32>
    %33 = vector.extract_strided_slice %30 {offsets = [0, 0], sizes = [1, 128], strides = [1, 1]} : vector<1x256xf32> to vector<1x128xf32>
    %34 = arith.addf %32, %33 : vector<1x128xf32>
    %35 = vector.broadcast %31 : vector<1x12xf32> to vector<8x12xf32>
    %36 = arith.addf %18, %35 : vector<8x12xf32>
    %cst_16 = arith.constant 0.000000e+00 : f32
    %37 = vector.broadcast %cst_16 : f32 to vector<8x12xf32>
    %38 = arith.cmpf ogt, %36, %37 : vector<8x12xf32>
    %cst_17 = arith.constant 0.00999999977 : f32
    %39 = vector.broadcast %cst_17 : f32 to vector<8x12xf32>
    %40 = arith.mulf %39, %36 : vector<8x12xf32>
    %41 = arith.select %38, %36, %40 : vector<8x12xi1>, vector<8x12xf32>
    %42 = vector.broadcast %8 : vector<1x12xf32> to vector<8x12xf32>
    %43 = arith.mulf %41, %42 : vector<8x12xf32>
    %cst_18 = arith.constant dense<0.000000e+00> : vector<8xf32>
    %44 = vector.multi_reduction <add>, %43, %cst_18 [1] : vector<8x12xf32> to vector<8xf32>
    %45 = vector.shape_cast %44 : vector<8xf32> to vector<8x1xf32>
    %46 = vector.broadcast %9 : vector<1x1xf32> to vector<8x1xf32>
    %47 = arith.addf %45, %46 : vector<8x1xf32>
    %cst_19 = arith.constant dense<0.000000e+00> : vector<1xf32>
    %48 = vector.multi_reduction <add>, %47, %cst_19 [0] : vector<8x1xf32> to vector<1xf32>
    %49 = vector.shape_cast %48 : vector<1xf32> to vector<1x1xf32>
    %50 = vector.broadcast %49 : vector<1x1xf32> to vector<8x1xf32>
    %51 = arith.divf %47, %50 : vector<8x1xf32>
    %52 = vector.broadcast %51 : vector<8x1xf32> to vector<8x16xf32>
    %53 = arith.mulf %52, %10 : vector<8x16xf32>
    %cst_20 = arith.constant dense<0.000000e+00> : vector<16xf32>
    %54 = vector.multi_reduction <add>, %53, %cst_20 [0] : vector<8x16xf32> to vector<16xf32>
    %55 = vector.shape_cast %54 : vector<16xf32> to vector<1x16xf32>
    %56 = arith.negf %34 : vector<1x128xf32>
    %57 = math.exp %56 : vector<1x128xf32>
    %cst_21 = arith.constant 1.000000e+00 : f32
    %58 = vector.broadcast %cst_21 : f32 to vector<1x128xf32>
    %59 = arith.addf %58, %57 : vector<1x128xf32>
    %60 = arith.divf %58, %59 : vector<1x128xf32>
    %61 = math.tanh %34 : vector<1x128xf32>
    %62 = vector.extract_strided_slice %60 {offsets = [0, 0], sizes = [1, 32], strides = [1, 1]} : vector<1x128xf32> to vector<1x32xf32>
    %63 = vector.extract_strided_slice %60 {offsets = [0, 32], sizes = [1, 32], strides = [1, 1]} : vector<1x128xf32> to vector<1x32xf32>
    %64 = vector.extract_strided_slice %61 {offsets = [0, 64], sizes = [1, 32], strides = [1, 1]} : vector<1x128xf32> to vector<1x32xf32>
    %65 = vector.extract_strided_slice %60 {offsets = [0, 96], sizes = [1, 32], strides = [1, 1]} : vector<1x128xf32> to vector<1x32xf32>
    %66 = arith.mulf %63, %29 : vector<1x32xf32>
    %67 = arith.mulf %62, %64 : vector<1x32xf32>
    %68 = arith.addf %66, %67 : vector<1x32xf32>
    %69 = math.tanh %68 : vector<1x32xf32>
    %70 = arith.mulf %65, %69 : vector<1x32xf32>
    %71 = tpu.concatenate %70, %55 in 1 : vector<1x32xf32>, vector<1x16xf32> -> vector<1x48xf32>
    %cst_22 = arith.constant dense<0.000000e+00> : vector<1x128xf32>
    %72 = tpu.matmul %71, %3, %cst_22 {dimension_numbers = #tpu.dot_dimension_numbers<[1], [0], [0], [1], [0, 0, 1, 1], [], []>} : vector<1x48xf32>, vector<48x128xf32>, vector<1x128xf32> -> vector<1x128xf32>
    %73 = vector.extract_strided_slice %72 {offsets = [0, 10], sizes = [1, 1], strides = [1, 1]} : vector<1x128xf32> to vector<1x1xf32>
    %74 = vector.extract_strided_slice %22 {offsets = [0, 0], sizes = [1, 1], strides = [1, 1]} : vector<8x1xf32> to vector<1x1xf32>
    %75 = arith.addf %73, %74 : vector<1x1xf32>
    %76 = arith.negf %75 : vector<1x1xf32>
    %77 = math.exp %76 : vector<1x1xf32>
    %cst_23 = arith.constant 1.000000e+00 : f32
    %78 = vector.broadcast %cst_23 : f32 to vector<1x1xf32>
    %79 = arith.addf %78, %77 : vector<1x1xf32>
    %80 = arith.divf %78, %79 : vector<1x1xf32>
    %81 = arith.addf %72, %6 : vector<1x128xf32>
    %cst_24 = arith.constant dense<0xFF800000> : vector<1xf32>
    %82 = vector.multi_reduction <maximumf>, %81, %cst_24 [1] : vector<1x128xf32> to vector<1xf32>
    %83 = vector.shape_cast %82 : vector<1xf32> to vector<1x1xf32>
    %84 = vector.broadcast %83 : vector<1x1xf32> to vector<1x128xf32>
    %85 = arith.subf %81, %84 : vector<1x128xf32>
    %86 = math.exp %85 : vector<1x128xf32>
    %cst_25 = arith.constant dense<0.000000e+00> : vector<1xf32>
    %87 = vector.multi_reduction <add>, %86, %cst_25 [1] : vector<1x128xf32> to vector<1xf32>
    %88 = vector.shape_cast %87 : vector<1xf32> to vector<1x1xf32>
    %89 = vector.broadcast %88 : vector<1x1xf32> to vector<1x128xf32>
    %90 = arith.divf %86, %89 : vector<1x128xf32>
    %91 = vector.broadcast %80 : vector<1x1xf32> to vector<1x128xf32>
    %92 = arith.mulf %91, %27 : vector<1x128xf32>
    %93 = arith.addf %90, %92 : vector<1x128xf32>
    %cst_26 = arith.constant dense<0.000000e+00> : vector<1x256xf32>
    %94 = tpu.matmul %70, %2, %cst_26 {dimension_numbers = #tpu.dot_dimension_numbers<[1], [0], [0], [1], [0, 0, 1, 1], [], []>} : vector<1x32xf32>, vector<32x256xf32>, vector<1x256xf32> -> vector<1x256xf32>
    %95 = vector.extract_strided_slice %94 {offsets = [0, 128], sizes = [1, 12], strides = [1, 1]} : vector<1x256xf32> to vector<1x12xf32>
    %96 = vector.extract_strided_slice %15 {offsets = [1, 0], sizes = [1, 128], strides = [1, 1]} : vector<8x128xf32> to vector<1x128xf32>
    %97 = vector.extract_strided_slice %94 {offsets = [0, 0], sizes = [1, 128], strides = [1, 1]} : vector<1x256xf32> to vector<1x128xf32>
    %98 = arith.addf %96, %97 : vector<1x128xf32>
    %99 = vector.broadcast %95 : vector<1x12xf32> to vector<8x12xf32>
    %100 = arith.addf %18, %99 : vector<8x12xf32>
    %cst_27 = arith.constant 0.000000e+00 : f32
    %101 = vector.broadcast %cst_27 : f32 to vector<8x12xf32>
    %102 = arith.cmpf ogt, %100, %101 : vector<8x12xf32>
    %cst_28 = arith.constant 0.00999999977 : f32
    %103 = vector.broadcast %cst_28 : f32 to vector<8x12xf32>
    %104 = arith.mulf %103, %100 : vector<8x12xf32>
    %105 = arith.select %102, %100, %104 : vector<8x12xi1>, vector<8x12xf32>
    %106 = vector.broadcast %8 : vector<1x12xf32> to vector<8x12xf32>
    %107 = arith.mulf %105, %106 : vector<8x12xf32>
    %cst_29 = arith.constant dense<0.000000e+00> : vector<8xf32>
    %108 = vector.multi_reduction <add>, %107, %cst_29 [1] : vector<8x12xf32> to vector<8xf32>
    %109 = vector.shape_cast %108 : vector<8xf32> to vector<8x1xf32>
    %110 = vector.broadcast %9 : vector<1x1xf32> to vector<8x1xf32>
    %111 = arith.addf %109, %110 : vector<8x1xf32>
    %cst_30 = arith.constant dense<0.000000e+00> : vector<1xf32>
    %112 = vector.multi_reduction <add>, %111, %cst_30 [0] : vector<8x1xf32> to vector<1xf32>
    %113 = vector.shape_cast %112 : vector<1xf32> to vector<1x1xf32>
    %114 = vector.broadcast %113 : vector<1x1xf32> to vector<8x1xf32>
    %115 = arith.divf %111, %114 : vector<8x1xf32>
    %116 = vector.broadcast %115 : vector<8x1xf32> to vector<8x16xf32>
    %117 = arith.mulf %116, %10 : vector<8x16xf32>
    %cst_31 = arith.constant dense<0.000000e+00> : vector<16xf32>
    %118 = vector.multi_reduction <add>, %117, %cst_31 [0] : vector<8x16xf32> to vector<16xf32>
    %119 = vector.shape_cast %118 : vector<16xf32> to vector<1x16xf32>
    %120 = arith.negf %98 : vector<1x128xf32>
    %121 = math.exp %120 : vector<1x128xf32>
    %cst_32 = arith.constant 1.000000e+00 : f32
    %122 = vector.broadcast %cst_32 : f32 to vector<1x128xf32>
    %123 = arith.addf %122, %121 : vector<1x128xf32>
    %124 = arith.divf %122, %123 : vector<1x128xf32>
    %125 = math.tanh %98 : vector<1x128xf32>
    %126 = vector.extract_strided_slice %124 {offsets = [0, 0], sizes = [1, 32], strides = [1, 1]} : vector<1x128xf32> to vector<1x32xf32>
    %127 = vector.extract_strided_slice %124 {offsets = [0, 32], sizes = [1, 32], strides = [1, 1]} : vector<1x128xf32> to vector<1x32xf32>
    %128 = vector.extract_strided_slice %125 {offsets = [0, 64], sizes = [1, 32], strides = [1, 1]} : vector<1x128xf32> to vector<1x32xf32>
    %129 = vector.extract_strided_slice %124 {offsets = [0, 96], sizes = [1, 32], strides = [1, 1]} : vector<1x128xf32> to vector<1x32xf32>
    %130 = arith.mulf %127, %68 : vector<1x32xf32>
    %131 = arith.mulf %126, %128 : vector<1x32xf32>
    %132 = arith.addf %130, %131 : vector<1x32xf32>
    %133 = math.tanh %132 : vector<1x32xf32>
    %134 = arith.mulf %129, %133 : vector<1x32xf32>
    %135 = tpu.concatenate %134, %119 in 1 : vector<1x32xf32>, vector<1x16xf32> -> vector<1x48xf32>
    %cst_33 = arith.constant dense<0.000000e+00> : vector<1x128xf32>
    %136 = tpu.matmul %135, %3, %cst_33 {dimension_numbers = #tpu.dot_dimension_numbers<[1], [0], [0], [1], [0, 0, 1, 1], [], []>} : vector<1x48xf32>, vector<48x128xf32>, vector<1x128xf32> -> vector<1x128xf32>
    %137 = vector.extract_strided_slice %136 {offsets = [0, 10], sizes = [1, 1], strides = [1, 1]} : vector<1x128xf32> to vector<1x1xf32>
    %138 = vector.extract_strided_slice %22 {offsets = [1, 0], sizes = [1, 1], strides = [1, 1]} : vector<8x1xf32> to vector<1x1xf32>
    %139 = arith.addf %137, %138 : vector<1x1xf32>
    %140 = arith.negf %139 : vector<1x1xf32>
    %141 = math.exp %140 : vector<1x1xf32>
    %cst_34 = arith.constant 1.000000e+00 : f32
    %142 = vector.broadcast %cst_34 : f32 to vector<1x1xf32>
    %143 = arith.addf %142, %141 : vector<1x1xf32>
    %144 = arith.divf %142, %143 : vector<1x1xf32>
    %145 = arith.addf %136, %6 : vector<1x128xf32>
    %cst_35 = arith.constant dense<0xFF800000> : vector<1xf32>
    %146 = vector.multi_reduction <maximumf>, %145, %cst_35 [1] : vector<1x128xf32> to vector<1xf32>
    %147 = vector.shape_cast %146 : vector<1xf32> to vector<1x1xf32>
    %148 = vector.broadcast %147 : vector<1x1xf32> to vector<1x128xf32>
    %149 = arith.subf %145, %148 : vector<1x128xf32>
    %150 = math.exp %149 : vector<1x128xf32>
    %cst_36 = arith.constant dense<0.000000e+00> : vector<1xf32>
    %151 = vector.multi_reduction <add>, %150, %cst_36 [1] : vector<1x128xf32> to vector<1xf32>
    %152 = vector.shape_cast %151 : vector<1xf32> to vector<1x1xf32>
    %153 = vector.broadcast %152 : vector<1x1xf32> to vector<1x128xf32>
    %154 = arith.divf %150, %153 : vector<1x128xf32>
    %155 = vector.broadcast %144 : vector<1x1xf32> to vector<1x128xf32>
    %156 = arith.mulf %155, %27 : vector<1x128xf32>
    %157 = arith.addf %154, %156 : vector<1x128xf32>
    %cst_37 = arith.constant dense<0.000000e+00> : vector<1x256xf32>
    %158 = tpu.matmul %134, %2, %cst_37 {dimension_numbers = #tpu.dot_dimension_numbers<[1], [0], [0], [1], [0, 0, 1, 1], [], []>} : vector<1x32xf32>, vector<32x256xf32>, vector<1x256xf32> -> vector<1x256xf32>
    %159 = vector.extract_strided_slice %158 {offsets = [0, 128], sizes = [1, 12], strides = [1, 1]} : vector<1x256xf32> to vector<1x12xf32>
    %160 = vector.extract_strided_slice %15 {offsets = [2, 0], sizes = [1, 128], strides = [1, 1]} : vector<8x128xf32> to vector<1x128xf32>
    %161 = vector.extract_strided_slice %158 {offsets = [0, 0], sizes = [1, 128], strides = [1, 1]} : vector<1x256xf32> to vector<1x128xf32>
    %162 = arith.addf %160, %161 : vector<1x128xf32>
    %163 = vector.broadcast %159 : vector<1x12xf32> to vector<8x12xf32>
    %164 = arith.addf %18, %163 : vector<8x12xf32>
    %cst_38 = arith.constant 0.000000e+00 : f32
    %165 = vector.broadcast %cst_38 : f32 to vector<8x12xf32>
    %166 = arith.cmpf ogt, %164, %165 : vector<8x12xf32>
    %cst_39 = arith.constant 0.00999999977 : f32
    %167 = vector.broadcast %cst_39 : f32 to vector<8x12xf32>
    %168 = arith.mulf %167, %164 : vector<8x12xf32>
    %169 = arith.select %166, %164, %168 : vector<8x12xi1>, vector<8x12xf32>
    %170 = vector.broadcast %8 : vector<1x12xf32> to vector<8x12xf32>
    %171 = arith.mulf %169, %170 : vector<8x12xf32>
    %cst_40 = arith.constant dense<0.000000e+00> : vector<8xf32>
    %172 = vector.multi_reduction <add>, %171, %cst_40 [1] : vector<8x12xf32> to vector<8xf32>
    %173 = vector.shape_cast %172 : vector<8xf32> to vector<8x1xf32>
    %174 = vector.broadcast %9 : vector<1x1xf32> to vector<8x1xf32>
    %175 = arith.addf %173, %174 : vector<8x1xf32>
    %cst_41 = arith.constant dense<0.000000e+00> : vector<1xf32>
    %176 = vector.multi_reduction <add>, %175, %cst_41 [0] : vector<8x1xf32> to vector<1xf32>
    %177 = vector.shape_cast %176 : vector<1xf32> to vector<1x1xf32>
    %178 = vector.broadcast %177 : vector<1x1xf32> to vector<8x1xf32>
    %179 = arith.divf %175, %178 : vector<8x1xf32>
    %180 = vector.broadcast %179 : vector<8x1xf32> to vector<8x16xf32>
    %181 = arith.mulf %180, %10 : vector<8x16xf32>
    %cst_42 = arith.constant dense<0.000000e+00> : vector<16xf32>
    %182 = vector.multi_reduction <add>, %181, %cst_42 [0] : vector<8x16xf32> to vector<16xf32>
    %183 = vector.shape_cast %182 : vector<16xf32> to vector<1x16xf32>
    %184 = arith.negf %162 : vector<1x128xf32>
    %185 = math.exp %184 : vector<1x128xf32>
    %cst_43 = arith.constant 1.000000e+00 : f32
    %186 = vector.broadcast %cst_43 : f32 to vector<1x128xf32>
    %187 = arith.addf %186, %185 : vector<1x128xf32>
    %188 = arith.divf %186, %187 : vector<1x128xf32>
    %189 = math.tanh %162 : vector<1x128xf32>
    %190 = vector.extract_strided_slice %188 {offsets = [0, 0], sizes = [1, 32], strides = [1, 1]} : vector<1x128xf32> to vector<1x32xf32>
    %191 = vector.extract_strided_slice %188 {offsets = [0, 32], sizes = [1, 32], strides = [1, 1]} : vector<1x128xf32> to vector<1x32xf32>
    %192 = vector.extract_strided_slice %189 {offsets = [0, 64], sizes = [1, 32], strides = [1, 1]} : vector<1x128xf32> to vector<1x32xf32>
    %193 = vector.extract_strided_slice %188 {offsets = [0, 96], sizes = [1, 32], strides = [1, 1]} : vector<1x128xf32> to vector<1x32xf32>
    %194 = arith.mulf %191, %132 : vector<1x32xf32>
    %195 = arith.mulf %190, %192 : vector<1x32xf32>
    %196 = arith.addf %194, %195 : vector<1x32xf32>
    %197 = math.tanh %196 : vector<1x32xf32>
    %198 = arith.mulf %193, %197 : vector<1x32xf32>
    %199 = tpu.concatenate %198, %183 in 1 : vector<1x32xf32>, vector<1x16xf32> -> vector<1x48xf32>
    %cst_44 = arith.constant dense<0.000000e+00> : vector<1x128xf32>
    %200 = tpu.matmul %199, %3, %cst_44 {dimension_numbers = #tpu.dot_dimension_numbers<[1], [0], [0], [1], [0, 0, 1, 1], [], []>} : vector<1x48xf32>, vector<48x128xf32>, vector<1x128xf32> -> vector<1x128xf32>
    %201 = vector.extract_strided_slice %200 {offsets = [0, 10], sizes = [1, 1], strides = [1, 1]} : vector<1x128xf32> to vector<1x1xf32>
    %202 = vector.extract_strided_slice %22 {offsets = [2, 0], sizes = [1, 1], strides = [1, 1]} : vector<8x1xf32> to vector<1x1xf32>
    %203 = arith.addf %201, %202 : vector<1x1xf32>
    %204 = arith.negf %203 : vector<1x1xf32>
    %205 = math.exp %204 : vector<1x1xf32>
    %cst_45 = arith.constant 1.000000e+00 : f32
    %206 = vector.broadcast %cst_45 : f32 to vector<1x1xf32>
    %207 = arith.addf %206, %205 : vector<1x1xf32>
    %208 = arith.divf %206, %207 : vector<1x1xf32>
    %209 = arith.addf %200, %6 : vector<1x128xf32>
    %cst_46 = arith.constant dense<0xFF800000> : vector<1xf32>
    %210 = vector.multi_reduction <maximumf>, %209, %cst_46 [1] : vector<1x128xf32> to vector<1xf32>
    %211 = vector.shape_cast %210 : vector<1xf32> to vector<1x1xf32>
    %212 = vector.broadcast %211 : vector<1x1xf32> to vector<1x128xf32>
    %213 = arith.subf %209, %212 : vector<1x128xf32>
    %214 = math.exp %213 : vector<1x128xf32>
    %cst_47 = arith.constant dense<0.000000e+00> : vector<1xf32>
    %215 = vector.multi_reduction <add>, %214, %cst_47 [1] : vector<1x128xf32> to vector<1xf32>
    %216 = vector.shape_cast %215 : vector<1xf32> to vector<1x1xf32>
    %217 = vector.broadcast %216 : vector<1x1xf32> to vector<1x128xf32>
    %218 = arith.divf %214, %217 : vector<1x128xf32>
    %219 = vector.broadcast %208 : vector<1x1xf32> to vector<1x128xf32>
    %220 = arith.mulf %219, %27 : vector<1x128xf32>
    %221 = arith.addf %218, %220 : vector<1x128xf32>
    %cst_48 = arith.constant dense<0.000000e+00> : vector<1x256xf32>
    %222 = tpu.matmul %198, %2, %cst_48 {dimension_numbers = #tpu.dot_dimension_numbers<[1], [0], [0], [1], [0, 0, 1, 1], [], []>} : vector<1x32xf32>, vector<32x256xf32>, vector<1x256xf32> -> vector<1x256xf32>
    %223 = vector.extract_strided_slice %222 {offsets = [0, 128], sizes = [1, 12], strides = [1, 1]} : vector<1x256xf32> to vector<1x12xf32>
    %224 = vector.extract_strided_slice %15 {offsets = [3, 0], sizes = [1, 128], strides = [1, 1]} : vector<8x128xf32> to vector<1x128xf32>
    %225 = vector.extract_strided_slice %222 {offsets = [0, 0], sizes = [1, 128], strides = [1, 1]} : vector<1x256xf32> to vector<1x128xf32>
    %226 = arith.addf %224, %225 : vector<1x128xf32>
    %227 = vector.broadcast %223 : vector<1x12xf32> to vector<8x12xf32>
    %228 = arith.addf %18, %227 : vector<8x12xf32>
    %cst_49 = arith.constant 0.000000e+00 : f32
    %229 = vector.broadcast %cst_49 : f32 to vector<8x12xf32>
    %230 = arith.cmpf ogt, %228, %229 : vector<8x12xf32>
    %cst_50 = arith.constant 0.00999999977 : f32
    %231 = vector.broadcast %cst_50 : f32 to vector<8x12xf32>
    %232 = arith.mulf %231, %228 : vector<8x12xf32>
    %233 = arith.select %230, %228, %232 : vector<8x12xi1>, vector<8x12xf32>
    %234 = vector.broadcast %8 : vector<1x12xf32> to vector<8x12xf32>
    %235 = arith.mulf %233, %234 : vector<8x12xf32>
    %cst_51 = arith.constant dense<0.000000e+00> : vector<8xf32>
    %236 = vector.multi_reduction <add>, %235, %cst_51 [1] : vector<8x12xf32> to vector<8xf32>
    %237 = vector.shape_cast %236 : vector<8xf32> to vector<8x1xf32>
    %238 = vector.broadcast %9 : vector<1x1xf32> to vector<8x1xf32>
    %239 = arith.addf %237, %238 : vector<8x1xf32>
    %cst_52 = arith.constant dense<0.000000e+00> : vector<1xf32>
    %240 = vector.multi_reduction <add>, %239, %cst_52 [0] : vector<8x1xf32> to vector<1xf32>
    %241 = vector.shape_cast %240 : vector<1xf32> to vector<1x1xf32>
    %242 = vector.broadcast %241 : vector<1x1xf32> to vector<8x1xf32>
    %243 = arith.divf %239, %242 : vector<8x1xf32>
    %244 = vector.broadcast %243 : vector<8x1xf32> to vector<8x16xf32>
    %245 = arith.mulf %244, %10 : vector<8x16xf32>
    %cst_53 = arith.constant dense<0.000000e+00> : vector<16xf32>
    %246 = vector.multi_reduction <add>, %245, %cst_53 [0] : vector<8x16xf32> to vector<16xf32>
    %247 = vector.shape_cast %246 : vector<16xf32> to vector<1x16xf32>
    %248 = arith.negf %226 : vector<1x128xf32>
    %249 = math.exp %248 : vector<1x128xf32>
    %cst_54 = arith.constant 1.000000e+00 : f32
    %250 = vector.broadcast %cst_54 : f32 to vector<1x128xf32>
    %251 = arith.addf %250, %249 : vector<1x128xf32>
    %252 = arith.divf %250, %251 : vector<1x128xf32>
    %253 = math.tanh %226 : vector<1x128xf32>
    %254 = vector.extract_strided_slice %252 {offsets = [0, 0], sizes = [1, 32], strides = [1, 1]} : vector<1x128xf32> to vector<1x32xf32>
    %255 = vector.extract_strided_slice %252 {offsets = [0, 32], sizes = [1, 32], strides = [1, 1]} : vector<1x128xf32> to vector<1x32xf32>
    %256 = vector.extract_strided_slice %253 {offsets = [0, 64], sizes = [1, 32], strides = [1, 1]} : vector<1x128xf32> to vector<1x32xf32>
    %257 = vector.extract_strided_slice %252 {offsets = [0, 96], sizes = [1, 32], strides = [1, 1]} : vector<1x128xf32> to vector<1x32xf32>
    %258 = arith.mulf %255, %196 : vector<1x32xf32>
    %259 = arith.mulf %254, %256 : vector<1x32xf32>
    %260 = arith.addf %258, %259 : vector<1x32xf32>
    %261 = math.tanh %260 : vector<1x32xf32>
    %262 = arith.mulf %257, %261 : vector<1x32xf32>
    %263 = tpu.concatenate %262, %247 in 1 : vector<1x32xf32>, vector<1x16xf32> -> vector<1x48xf32>
    %cst_55 = arith.constant dense<0.000000e+00> : vector<1x128xf32>
    %264 = tpu.matmul %263, %3, %cst_55 {dimension_numbers = #tpu.dot_dimension_numbers<[1], [0], [0], [1], [0, 0, 1, 1], [], []>} : vector<1x48xf32>, vector<48x128xf32>, vector<1x128xf32> -> vector<1x128xf32>
    %265 = vector.extract_strided_slice %264 {offsets = [0, 10], sizes = [1, 1], strides = [1, 1]} : vector<1x128xf32> to vector<1x1xf32>
    %266 = vector.extract_strided_slice %22 {offsets = [3, 0], sizes = [1, 1], strides = [1, 1]} : vector<8x1xf32> to vector<1x1xf32>
    %267 = arith.addf %265, %266 : vector<1x1xf32>
    %268 = arith.negf %267 : vector<1x1xf32>
    %269 = math.exp %268 : vector<1x1xf32>
    %cst_56 = arith.constant 1.000000e+00 : f32
    %270 = vector.broadcast %cst_56 : f32 to vector<1x1xf32>
    %271 = arith.addf %270, %269 : vector<1x1xf32>
    %272 = arith.divf %270, %271 : vector<1x1xf32>
    %273 = arith.addf %264, %6 : vector<1x128xf32>
    %cst_57 = arith.constant dense<0xFF800000> : vector<1xf32>
    %274 = vector.multi_reduction <maximumf>, %273, %cst_57 [1] : vector<1x128xf32> to vector<1xf32>
    %275 = vector.shape_cast %274 : vector<1xf32> to vector<1x1xf32>
    %276 = vector.broadcast %275 : vector<1x1xf32> to vector<1x128xf32>
    %277 = arith.subf %273, %276 : vector<1x128xf32>
    %278 = math.exp %277 : vector<1x128xf32>
    %cst_58 = arith.constant dense<0.000000e+00> : vector<1xf32>
    %279 = vector.multi_reduction <add>, %278, %cst_58 [1] : vector<1x128xf32> to vector<1xf32>
    %280 = vector.shape_cast %279 : vector<1xf32> to vector<1x1xf32>
    %281 = vector.broadcast %280 : vector<1x1xf32> to vector<1x128xf32>
    %282 = arith.divf %278, %281 : vector<1x128xf32>
    %283 = vector.broadcast %272 : vector<1x1xf32> to vector<1x128xf32>
    %284 = arith.mulf %283, %27 : vector<1x128xf32>
    %285 = arith.addf %282, %284 : vector<1x128xf32>
    %cst_59 = arith.constant dense<0.000000e+00> : vector<1x256xf32>
    %286 = tpu.matmul %262, %2, %cst_59 {dimension_numbers = #tpu.dot_dimension_numbers<[1], [0], [0], [1], [0, 0, 1, 1], [], []>} : vector<1x32xf32>, vector<32x256xf32>, vector<1x256xf32> -> vector<1x256xf32>
    %287 = vector.extract_strided_slice %286 {offsets = [0, 128], sizes = [1, 12], strides = [1, 1]} : vector<1x256xf32> to vector<1x12xf32>
    %288 = vector.extract_strided_slice %15 {offsets = [4, 0], sizes = [1, 128], strides = [1, 1]} : vector<8x128xf32> to vector<1x128xf32>
    %289 = vector.extract_strided_slice %286 {offsets = [0, 0], sizes = [1, 128], strides = [1, 1]} : vector<1x256xf32> to vector<1x128xf32>
    %290 = arith.addf %288, %289 : vector<1x128xf32>
    %291 = vector.broadcast %287 : vector<1x12xf32> to vector<8x12xf32>
    %292 = arith.addf %18, %291 : vector<8x12xf32>
    %cst_60 = arith.constant 0.000000e+00 : f32
    %293 = vector.broadcast %cst_60 : f32 to vector<8x12xf32>
    %294 = arith.cmpf ogt, %292, %293 : vector<8x12xf32>
    %cst_61 = arith.constant 0.00999999977 : f32
    %295 = vector.broadcast %cst_61 : f32 to vector<8x12xf32>
    %296 = arith.mulf %295, %292 : vector<8x12xf32>
    %297 = arith.select %294, %292, %296 : vector<8x12xi1>, vector<8x12xf32>
    %298 = vector.broadcast %8 : vector<1x12xf32> to vector<8x12xf32>
    %299 = arith.mulf %297, %298 : vector<8x12xf32>
    %cst_62 = arith.constant dense<0.000000e+00> : vector<8xf32>
    %300 = vector.multi_reduction <add>, %299, %cst_62 [1] : vector<8x12xf32> to vector<8xf32>
    %301 = vector.shape_cast %300 : vector<8xf32> to vector<8x1xf32>
    %302 = vector.broadcast %9 : vector<1x1xf32> to vector<8x1xf32>
    %303 = arith.addf %301, %302 : vector<8x1xf32>
    %cst_63 = arith.constant dense<0.000000e+00> : vector<1xf32>
    %304 = vector.multi_reduction <add>, %303, %cst_63 [0] : vector<8x1xf32> to vector<1xf32>
    %305 = vector.shape_cast %304 : vector<1xf32> to vector<1x1xf32>
    %306 = vector.broadcast %305 : vector<1x1xf32> to vector<8x1xf32>
    %307 = arith.divf %303, %306 : vector<8x1xf32>
    %308 = vector.broadcast %307 : vector<8x1xf32> to vector<8x16xf32>
    %309 = arith.mulf %308, %10 : vector<8x16xf32>
    %cst_64 = arith.constant dense<0.000000e+00> : vector<16xf32>
    %310 = vector.multi_reduction <add>, %309, %cst_64 [0] : vector<8x16xf32> to vector<16xf32>
    %311 = vector.shape_cast %310 : vector<16xf32> to vector<1x16xf32>
    %312 = arith.negf %290 : vector<1x128xf32>
    %313 = math.exp %312 : vector<1x128xf32>
    %cst_65 = arith.constant 1.000000e+00 : f32
    %314 = vector.broadcast %cst_65 : f32 to vector<1x128xf32>
    %315 = arith.addf %314, %313 : vector<1x128xf32>
    %316 = arith.divf %314, %315 : vector<1x128xf32>
    %317 = math.tanh %290 : vector<1x128xf32>
    %318 = vector.extract_strided_slice %316 {offsets = [0, 0], sizes = [1, 32], strides = [1, 1]} : vector<1x128xf32> to vector<1x32xf32>
    %319 = vector.extract_strided_slice %316 {offsets = [0, 32], sizes = [1, 32], strides = [1, 1]} : vector<1x128xf32> to vector<1x32xf32>
    %320 = vector.extract_strided_slice %317 {offsets = [0, 64], sizes = [1, 32], strides = [1, 1]} : vector<1x128xf32> to vector<1x32xf32>
    %321 = vector.extract_strided_slice %316 {offsets = [0, 96], sizes = [1, 32], strides = [1, 1]} : vector<1x128xf32> to vector<1x32xf32>
    %322 = arith.mulf %319, %260 : vector<1x32xf32>
    %323 = arith.mulf %318, %320 : vector<1x32xf32>
    %324 = arith.addf %322, %323 : vector<1x32xf32>
    %325 = math.tanh %324 : vector<1x32xf32>
    %326 = arith.mulf %321, %325 : vector<1x32xf32>
    %327 = tpu.concatenate %326, %311 in 1 : vector<1x32xf32>, vector<1x16xf32> -> vector<1x48xf32>
    %cst_66 = arith.constant dense<0.000000e+00> : vector<1x128xf32>
    %328 = tpu.matmul %327, %3, %cst_66 {dimension_numbers = #tpu.dot_dimension_numbers<[1], [0], [0], [1], [0, 0, 1, 1], [], []>} : vector<1x48xf32>, vector<48x128xf32>, vector<1x128xf32> -> vector<1x128xf32>
    %329 = vector.extract_strided_slice %328 {offsets = [0, 10], sizes = [1, 1], strides = [1, 1]} : vector<1x128xf32> to vector<1x1xf32>
    %330 = vector.extract_strided_slice %22 {offsets = [4, 0], sizes = [1, 1], strides = [1, 1]} : vector<8x1xf32> to vector<1x1xf32>
    %331 = arith.addf %329, %330 : vector<1x1xf32>
    %332 = arith.negf %331 : vector<1x1xf32>
    %333 = math.exp %332 : vector<1x1xf32>
    %cst_67 = arith.constant 1.000000e+00 : f32
    %334 = vector.broadcast %cst_67 : f32 to vector<1x1xf32>
    %335 = arith.addf %334, %333 : vector<1x1xf32>
    %336 = arith.divf %334, %335 : vector<1x1xf32>
    %337 = arith.addf %328, %6 : vector<1x128xf32>
    %cst_68 = arith.constant dense<0xFF800000> : vector<1xf32>
    %338 = vector.multi_reduction <maximumf>, %337, %cst_68 [1] : vector<1x128xf32> to vector<1xf32>
    %339 = vector.shape_cast %338 : vector<1xf32> to vector<1x1xf32>
    %340 = vector.broadcast %339 : vector<1x1xf32> to vector<1x128xf32>
    %341 = arith.subf %337, %340 : vector<1x128xf32>
    %342 = math.exp %341 : vector<1x128xf32>
    %cst_69 = arith.constant dense<0.000000e+00> : vector<1xf32>
    %343 = vector.multi_reduction <add>, %342, %cst_69 [1] : vector<1x128xf32> to vector<1xf32>
    %344 = vector.shape_cast %343 : vector<1xf32> to vector<1x1xf32>
    %345 = vector.broadcast %344 : vector<1x1xf32> to vector<1x128xf32>
    %346 = arith.divf %342, %345 : vector<1x128xf32>
    %347 = vector.broadcast %336 : vector<1x1xf32> to vector<1x128xf32>
    %348 = arith.mulf %347, %27 : vector<1x128xf32>
    %349 = arith.addf %346, %348 : vector<1x128xf32>
    %cst_70 = arith.constant 0.000000e+00 : f32
    %350 = vector.broadcast %cst_70 : f32 to vector<3x128xf32>
    %351 = tpu.concatenate %93, %157, %221, %285, %349, %350 in 0 : vector<1x128xf32>, vector<1x128xf32>, vector<1x128xf32>, vector<1x128xf32>, vector<1x128xf32>, vector<3x128xf32> -> vector<8x128xf32>
    %c0_71 = arith.constant 0 : index
    %c0_72 = arith.constant 0 : index
    %352 = vector.load %arg4[%c0_71, %c0_72] : memref<8x128xf32, #tpu.memory_space<vmem>>, vector<8x128xf32>
    tpu.vector_store %arg4[%c0_71, %c0_72], %351 {strides = array<i32>} : memref<8x128xf32, #tpu.memory_space<vmem>>, vector<8x128xf32>,
    return
  }
  func.func @transform_0(%arg0: i32) -> (i32, i32) {
    %c0_i32 = arith.constant 0 : i32
    %c0_i32_0 = arith.constant 0 : i32
    %c0_i32_1 = arith.constant 0 : i32
    return %c0_i32, %c0_i32_0 : i32, i32
  }
  func.func @transform_1(%arg0: i32) -> (i32, i32) {
    %c0_i32 = arith.constant 0 : i32
    %c0_i32_0 = arith.constant 0 : i32
    %c0_i32_1 = arith.constant 0 : i32
    return %c0_i32, %c0_i32_0 : i32, i32
  }
  func.func @transform_2(%arg0: i32) -> (i32, i32) {
    %c0_i32 = arith.constant 0 : i32
    %c0_i32_0 = arith.constant 0 : i32
    %c0_i32_1 = arith.constant 0 : i32
    return %c0_i32, %c0_i32_0 : i32, i32
  }
  func.func @transform_3(%arg0: i32) -> (i32, i32) {
    %c0_i32 = arith.constant 0 : i32
    %c0_i32_0 = arith.constant 0 : i32
    %c0_i32_1 = arith.constant 0 : i32
    return %c0_i32, %c0_i32_0 : i32, i32
  }
}

</mosaic_0001>

<bundles_post_ra>
// kernel: _forward_jit.1
= control target key start
LH: loop header
LB: loop body
LE: loop exit
PB: predicated region body
PF: predicated region fallthrough
CT: control target
= control target key end

     0   :  { %v1772_v3 = vmov 0.0   ;;  %vm41_vm0 = vcmask 130048   ;;  %s1773_s16 = smov 64   ;;  %s1774_s17 = smov 32   ;;  %vm153_vm1 = vcmask 261120   ;;  %v148_v63 = vlaneseq  ;;  %s2164_s1 = inlined_call_operand.vmem [shape: f32[96,256], index: 1, kind: input, shape index: {}]   ;;  %s2165_s0 = inlined_call_operand.vmem [shape: f32[24,16], index: 0, kind: input, shape index: {}]   ;;  %s2166_s2 = inlined_call_operand.vmem [shape: f32[8,128], index: 2, kind: input, shape index: {}]   ;;  %s2167_s3 = inlined_call_operand.vmem [shape: f32[8,128], index: 3, kind: output, shape index: {}]  }
   0x1   :  { %v18_v0 = vld [vmem:[%s2164_s1 + $0x8] sm:$0xff]  ;;  %v20_v1 = vld [vmem:[%s2164_s1 + $0x18] sm:$0xff]  ;;  %115 = vmatprep.mubr.f32.mxu0 %v1772_v3  ;;  %221 = vmatprep.mubr.f32.mxu1 %v1772_v3  ;;  %v17_v6 = vld [vmem:[%s2164_s1] sm:$0xff]  ;;  %vm242_vm3 = vcmask 97280   ;;  %vm251_vm4 = vcmask 7168   ;;  %vm1777_vm6 = vmmov 0  }
   0x2   :  { %v22_v2 = vld [vmem:[%s2164_s1 + $0x28] sm:$0xff]  ;;  %v1582_v4 = vpack.c.bf16 %v20_v1, %v18_v0  ;;  %v24_v5 = vld [vmem:[%s2164_s1 + $0x38] sm:$0xff]  ;;  %v19_v7 = vld [vmem:[%s2164_s1 + $0x10] sm:$0xff]  ;;  %v230_v0 = vshrl.u32 %v148_v63, 7  ;;  %vm307_vm7 = vcmask 392192   ;;  %vm389_vm11 = vcmask 1040384  }
   0x3   :  { %v1819_v8 = vpack.c.bf16 %v24_v5, %v22_v2  ;;  %v1584_v9 = vpack.c.bf16 %v19_v7, %v17_v6  ;;  %v21_v10 = vld [vmem:[%s2164_s1 + $0x20] sm:$0xff]  ;;  %v23_v11 = vld [vmem:[%s2164_s1 + $0x30] sm:$0xff]  ;;  %v26_v13 = vld [vmem:[%s2164_s1 + $0x48] sm:$0xff]  ;;  %vm1431_vm13 = vcmask 1041408   ;;  %vm1433_vm14 = vcmask 1042432  }
   0x4   :  { %1583 = vmatprep.subr.bf16.mxu0 %v1582_v4  ;;  %v1827_v12 = vpack.c.bf16 %v23_v11, %v21_v10  ;;  %v28_v14 = vld [vmem:[%s2164_s1 + $0x58] sm:$0xff]  ;;  %v14_v15 = vld [vmem:[%s2165_s0] sm:$0xff]  ;;  %v27_v18 = vld [vmem:[%s2164_s1 + $0x50] sm:$0xff]  ;;  %v1907_v2 = vsub.s32 0, %v230_v0  ;;  %vm1435_vm15 = vcmask 1043456  }
   0x5   :  { %1587 = vmatprep.subr.bf16.mxu1 %v1819_v8  ;;  %1585 = vmatpush1.bf16.msra.mxu0 %v1584_v9  ;;  %v1839_v16 = vpack.c.bf16 %v28_v14, %v26_v13  ;;  %v25_v17 = vld [vmem:[%s2164_s1 + $0x40] sm:$0xff]  ;;  %v1856_v20 = vld [vmem:[%s2165_s0 + $0x8] sm:$0xff]  ;;  %v1865_v21 = vld [vmem:[%s2165_s0 + $0x10] sm:$0xff] }
   0x6   :  { %1589 = vmatpush1.bf16.msra.mxu1 %v1827_v12  ;;  %v1848_v19 = vpack.c.bf16 %v27_v18, %v25_v17  ;;  %v1447_v22 = vld [vmem:[%s2166_s2] ss:$0 sm:$0xff]  ;;  %v1448_v1 = vld [vmem:[%s2166_s2 + $0x1] ss:$0 sm:$0xff]  ;;  %v1917_v9 = vld [vmem:[%s2166_s2 + $0x4] ss:$0 sm:$0xff] }
   0x7   :  { %1591 = vmatprep.subr.bf16.mxu1 %v1839_v16 }
   0x8   :  { %1444 = vmatmul.mubr.msk.f32.vlgmr.msra.gmra.mrb[0].mxu0 %vm41_vm0, %v14_v15 }
   0x9   :  { %120 = vmatprep.mubr.f32.mxu0 %v1772_v3 }
   0xa   :  { %1593 = vmatpush1.bf16.msra.mxu1 %v1848_v19 }
   0xb   :  { %1604 = vmatprep.subr.bf16.mxu1 %v1819_v8 }
   0xc   :  { %1445 = vmatmul.mubr.msk.f32.gmra.mrb[2].mxu0 %vm41_vm0, %v1856_v20 }
   0xd   :  { %222 = vmatmul.mubr.f32.vlgmr.msra.gmra.mrb[0].mxu1 %v1772_v3  ;;  %124 = vmatprep.mubr.f32.mxu0 %v1772_v3 }
   0xe   :  { %1606 = vmatpush1.bf16.msra.mxu1 %v1827_v12  ;;  %474 = vmatprep.mubr.f32.mxu1 %v1772_v3 }
   0xf   :  { %1608 = vmatprep.subr.bf16.mxu1 %v1839_v16 }
  0x10   :  { %1446 = vmatmul.mubr.msk.f32.gmra.mrb[4].mxu0 %vm41_vm0, %v1865_v21 }
  0x11   :  { %1519 = vmatprep.mubr.msk.f32.mxu0 %vm1777_vm6, %v1772_v3 }
  0x12   :  { %1610 = vmatpush1.bf16.msra.mxu1 %v1848_v19 }
  0x13   :  { %1621 = vmatprep.subr.bf16.mxu1 %v1819_v8 }
  0xdb   :  { %v117_v23 = vpop.f32.mrb[0].mxu0 }
  0xdc   :  { %v119_v24 = vpop.f32.mrb[1].mxu0  ;;  %v1879_v25 = vadd.f32 %v1447_v22, %v117_v23  ;;  %v1775_v22 = vmov 0  }
  0xdd   :  { %1678 = vset.pattern.permute.xlu1 %v1775_v22  ;;  %1679 = vset.pattern.permute.xlu0 %v1775_v22 }
  0xdf   :  { %v122_v26 = vpop.f32.mrb[2].mxu0 }
  0xe0   :  { %v223_v27 = vpop.f32.mrb[0].mxu1  ;;  %v123_v28 = vpop.f32.mrb[3].mxu0 }
  0xe1   :  { %v228_v29 = vadd.f32 %v223_v27, %v1879_v25  ;;  %v1882_v30 = vpop.f32.mrb[1].mxu1 }
  0xe2   :  { %v232_v5 = vrot.slane %v1882_v30, %v1907_v2 }
  0xe3   :  { %1682 = vtanh.f32 %v228_v29  ;;  %v126_v31 = vpop.f32.mrb[4].mxu0  ;;  %v1453_v34 = vmul.f32 -1.442695, %v228_v29  ;;  %v1933_v29 = vld [vmem:[%s2166_s2 + $0x5] ss:$0 sm:$0xff] }
  0xe4   :  { %v127_v32 = vpop.f32.mrb[5].mxu0 }
  0xe5   :  { %1684 = vpow2.f32 %v1453_v34  ;;  %v1909_v4 = vadd.f32 %v1448_v1, %v127_v32 }
  0xe7   :  { %v233_v6 = vadd.f32 %v232_v5, %v1909_v4 }
  0xe9   :  { %v235_v7 = vmul.f32 0.01, %v233_v6  ;;  %vm234_vm2 = vcmp.gt.f32.partialorder %v233_v6, 0.0 }
  0xeb   :  { %v236_v10 = vsel %vm234_vm2, %v233_v6, %v235_v7 }
  0xec   :  { %v241_v11 = vmul.f32 %v1917_v9, %v236_v10 }
  0xed   :  { %v1683_v33 = vpop.eup %1682 }
  0xee   :  { %283 = vrot.lane.b32.xlu0 %v1683_v33, %s1773_s16  ;;  %v243_v13 = vsel %vm242_vm3, %v241_v11, 0.0 }
  0xef   :  { %v1685_v35 = vpop.eup %1684 }
  0xf0   :  { %v277_v36 = vadd.f32 1.0, %v1685_v35 }
  0xf2   :  { %1686 = vrcp.f32 %v277_v36 }
  0xfc   :  { %v1687_v37 = vpop.eup %1686 }
  0xfd   :  { %v281_v40 = vmul.f32 0.0, %v1687_v37 }
 0x160   :  { %v284_v38 = vpop.permute.xlu0 %283 }
 0x161   :  { %v286_v39 = vmul.f32 %v1687_v37, %v284_v38 }
 0x163   :  { %288 = vrot.lane.b32.xlu0 %v286_v39, %s1774_s17 }
 0x1d5   :  { %v289_v41 = vpop.permute.xlu0 %288 }
 0x1d6   :  { %v291_v42 = vadd.f32 %v289_v41, %v281_v40 }
 0x1d8   :  { %1688 = vtanh.f32 %v291_v42  ;;  %v528_v58 = vrot.slane %v291_v42, 7 }
 0x1e2   :  { %v1689_v43 = vpop.eup %1688 }
 0x1e3   :  { %294 = vrot.lane.b32.xlu1 %v1689_v43, %s1773_s16 }
 0x255   :  { %v295_v44 = vpop.permute.xlu1 %294 }
 0x256   :  { %v297_v45 = vmul.f32 %v1687_v37, %v295_v44 }
 0x258   :  { %299 = vrot.lane.b32.xlu1 %v297_v45, %s1774_s17 }
 0x2ca   :  { %v1888_v46 = vpop.permute.xlu1 %299 }
 0x2cb   :  { %1456 = vmatmul.mubr.msk.f32.vlgmr.msra.gmra.mrb[2].mxu1 %vm153_vm1, %v1888_v46 }
 0x2cc   :  { %1623 = vmatpush1.bf16.msra.mxu1 %v1827_v12  ;;  %728 = vmatprep.mubr.f32.mxu1 %v1772_v3 }
 0x2cd   :  { %1625 = vmatprep.subr.bf16.mxu1 %v1839_v16 }
 0x2d0   :  { %1627 = vmatpush1.bf16.msra.mxu1 %v1848_v19 }
 0x39e   :  { %v476_v47 = vpop.f32.mrb[2].mxu1 }
 0x39f   :  { %v482_v48 = vrot.slane %v476_v47, 7  ;;  %v478_v49 = vpop.f32.mrb[3].mxu1 }
 0x3a0   :  { %v488_v34 = vrot.slane %v478_v49, %v1907_v2 }
 0x3a1   :  { %v484_v50 = vadd.f32 %v482_v48, %v1879_v25 }
 0x3a2   :  { %v489_v36 = vadd.f32 %v488_v34, %v1909_v4 }
 0x3a3   :  { %1690 = vtanh.f32 %v484_v50  ;;  %v1457_v52 = vmul.f32 -1.442695, %v484_v50 }
 0x3a4   :  { %v491_v38 = vmul.f32 0.01, %v489_v36  ;;  %vm490_vm5 = vcmp.gt.f32.partialorder %v489_v36, 0.0 }
 0x3a5   :  { %1692 = vpow2.f32 %v1457_v52 }
 0x3a6   :  { %v492_v40 = vsel %vm490_vm5, %v489_v36, %v491_v38 }
 0x3a7   :  { %v493_v42 = vmul.f32 %v1917_v9, %v492_v40 }
 0x3a9   :  { %v494_v44 = vsel %vm242_vm3, %v493_v42, 0.0 }
 0x3ad   :  { %v1691_v51 = vpop.eup %1690 }
 0x3ae   :  { %532 = vrot.lane.b32.xlu0 %v1691_v51, %s1773_s16 }
 0x3af   :  { %v1693_v53 = vpop.eup %1692 }
 0x3b0   :  { %v523_v54 = vadd.f32 1.0, %v1693_v53 }
 0x3b2   :  { %1694 = vrcp.f32 %v523_v54  ;;  %v29_v54 = vld [vmem:[%s2164_s1 + $0x60] sm:$0xff] }
 0x3bc   :  { %v1695_v55 = vpop.eup %1694 }
 0x3bd   :  { %v530_v59 = vmul.f32 %v1695_v55, %v528_v58 }
 0x420   :  { %v533_v56 = vpop.permute.xlu0 %532 }
 0x421   :  { %v535_v57 = vmul.f32 %v1695_v55, %v533_v56  ;;  %v31_v56 = vld [vmem:[%s2164_s1 + $0x80] sm:$0xff] }
 0x423   :  { %537 = vrot.lane.b32.xlu1 %v535_v57, %s1774_s17  ;;  %v1776_v57 = vmov 0.0|0.0  }
 0x424   :  { %1594 = vmatprep.subr.bf16.mxu0 %v1776_v57  ;;  %1628 = vmatprep.subr.bf16.mxu1 %v1776_v57 }
 0x495   :  { %v538_v60 = vpop.permute.xlu1 %537 }
 0x496   :  { %v1899_v61 = vadd.f32 %v538_v60, %v530_v59  ;;  %v32_v59 = vld [vmem:[%s2164_s1 + $0x90] sm:$0xff] }
 0x497   :  { %v1962_v60 = vpack.c.bf16 %v32_v59, %v31_v56 }
 0x498   :  { %1696 = vtanh.f32 %v1899_v61  ;;  %v782_v36 = vrot.slane %v1899_v61, 7 }
 0x4a2   :  { %v1697_v62 = vpop.eup %1696 }
 0x4a3   :  { %543 = vrot.lane.b32.xlu0 %v1697_v62, %s1773_s16 }
 0x4c2   :  { %244 = vadd.xlane.f32.xlu0 %v243_v13 }
 0x515   :  { %v544_v14 = vpop.permute.xlu0 %543 }
 0x516   :  { %v1921_v15 = vmul.f32 %v1695_v55, %v544_v14  ;;  %v30_v55 = vld [vmem:[%s2164_s1 + $0x70] sm:$0xff] }
 0x517   :  { %v1955_v58 = vpack.c.bf16 %v30_v55, %v29_v54 }
 0x518   :  { %v659_v17 = vrot.slane %v1921_v15, 1 }
 0x519   :  { %1596 = vmatpush3.bf16.msra.mxu0 %v1955_v58 }
 0x51a   :  { %660 = vrot.lane.b32.xlu1 %v659_v17, %s1774_s17  ;;  %1597 = vmatprep.subr.bf16.mxu0 %v1776_v57 }
 0x51d   :  { %1599 = vmatpush3.bf16.msra.mxu0 %v1962_v60 }
 0x51e   :  { %1600 = vmatprep.subr.bf16.mxu0 %v1776_v57 }
 0x54f   :  { %v245_v30 = vpop.xlane.xlu0 %244 }
 0x550   :  { %v250_v31 = vadd.f32 %v1933_v29, %v245_v30 }
 0x552   :  { %v252_v32 = vsel %vm251_vm4, %v250_v31, 0.0 }
 0x553   :  { %v253_v33 = vrot.slane %v252_v32, 4 }
 0x555   :  { %v254_v35 = vadd.f32 %v253_v33, %v252_v32  ;;  %v33_v32 = vld [vmem:[%s2164_s1 + $0xa0] sm:$0xff]  ;;  %v34_v33 = vld [vmem:[%s2164_s1 + $0xb0] sm:$0xff] }
 0x556   :  { %v1981_v34 = vpack.c.bf16 %v34_v33, %v33_v32 }
 0x557   :  { %v255_v37 = vrot.slane %v254_v35, 2 }
 0x558   :  { %1602 = vmatpush3.bf16.msra.mxu0 %v1981_v34 }
 0x559   :  { %v256_v39 = vadd.f32 %v255_v37, %v254_v35  ;;  %1611 = vmatprep.subr.bf16.mxu0 %v1776_v57 }
 0x55b   :  { %v257_v41 = vrot.slane %v256_v39, 1 }
 0x55d   :  { %v258_v43 = vadd.f32 %v257_v41, %v256_v39 }
 0x58c   :  { %v661_v18 = vpop.permute.xlu1 %660 }
 0x58d   :  { %1460 = vmatmul.mubr.msk.f32.vlgmr.msra.gmra.mrb[4].mxu1 %vm153_vm1, %v661_v18 }
 0x58e   :  { %1630 = vmatpush3.bf16.msra.mxu1 %v1955_v58  ;;  %1549 = vmatprep.mubr.msk.f32.mxu1 %vm1777_vm6, %v1772_v3 }
 0x58f   :  { %1631 = vmatprep.subr.bf16.mxu1 %v1776_v57 }
 0x592   :  { %1633 = vmatpush3.bf16.msra.mxu1 %v1962_v60 }
 0x593   :  { %1634 = vmatprep.subr.bf16.mxu1 %v1776_v57 }
 0x596   :  { %1636 = vmatpush3.bf16.msra.mxu1 %v1981_v34 }
 0x597   :  { %1655 = vmatprep.subr.bf16.mxu1 %v1819_v8 }
 0x660   :  { %v730_v23 = vpop.f32.mrb[4].mxu1 }
 0x661   :  { %v736_v24 = vrot.slane %v730_v23, 6  ;;  %v1926_v26 = vpop.f32.mrb[5].mxu1 }
 0x662   :  { %v742_v54 = vrot.slane %v1926_v26, %v1907_v2 }
 0x663   :  { %v738_v27 = vadd.f32 %v736_v24, %v1879_v25 }
 0x664   :  { %v743_v55 = vadd.f32 %v742_v54, %v1909_v4 }
 0x665   :  { %1698 = vtanh.f32 %v738_v27  ;;  %v1461_v48 = vmul.f32 -1.442695, %v738_v27 }
 0x666   :  { %1700 = vrcp.f32 %v258_v43  ;;  %v745_v56 = vmul.f32 0.01, %v743_v55  ;;  %vm744_vm8 = vcmp.gt.f32.partialorder %v743_v55, 0.0 }
 0x667   :  { %1702 = vpow2.f32 %v1461_v48 }
 0x668   :  { %v746_v59 = vsel %vm744_vm8, %v743_v55, %v745_v56 }
 0x66f   :  { %v1699_v28 = vpop.eup %1698 }
 0x670   :  { %786 = vrot.lane.b32.xlu1 %v1699_v28, %s1773_s16  ;;  %v1701_v45 = vpop.eup %1700 }
 0x671   :  { %v260_v47 = vmul.f32 %v1701_v45, %v250_v31  ;;  %v1703_v49 = vpop.eup %1702 }
 0x672   :  { %v777_v50 = vadd.f32 1.0, %v1703_v49 }
 0x674   :  { %1704 = vrcp.f32 %v777_v50 }
 0x67e   :  { %v1941_v51 = vpop.eup %1704 }
 0x67f   :  { %v784_v37 = vmul.f32 %v1941_v51, %v782_v36 }
 0x694   :  { %495 = vadd.xlane.f32.xlu1 %v494_v44 }
 0x6a5   :  { %263 = vperm.xlu1 %1678, %v260_v47  }
 0x6e2   :  { %v787_v52 = vpop.permute.xlu1 %786 }
 0x6e3   :  { %v789_v53 = vmul.f32 %v1941_v51, %v787_v52 }
 0x6e5   :  { %791 = vrot.lane.b32.xlu0 %v789_v53, %s1774_s17 }
 0x721   :  { %v496_v62 = vpop.xlane.xlu1 %495 }
 0x722   :  { %v497_v0 = vadd.f32 %v1933_v29, %v496_v62  ;;  %v747_v62 = vmul.f32 %v1917_v9, %v746_v59 }
 0x724   :  { %v498_v1 = vsel %vm251_vm4, %v497_v0, 0.0 }
 0x725   :  { %v499_v5 = vrot.slane %v498_v1, 4  ;;  %v264_v6 = vpop.permute.xlu1 %263 }
 0x726   :  { %v266_v7 = vmul.f32 %v264_v6, %v1865_v21 }
 0x727   :  { %v500_v10 = vadd.f32 %v499_v5, %v498_v1 }
 0x728   :  { %v267_v13 = vsel %vm41_vm0, %v266_v7, 0.0 }
 0x729   :  { %v501_v11 = vrot.slane %v500_v10, 2  ;;  %v268_v17 = vrot.slane %v267_v13, 4 }
 0x72b   :  { %v502_v14 = vadd.f32 %v501_v11, %v500_v10  ;;  %v269_v23 = vadd.f32 %v268_v17, %v267_v13 }
 0x72d   :  { %v503_v18 = vrot.slane %v502_v14, 1  ;;  %v270_v24 = vrot.slane %v269_v23, 2 }
 0x72f   :  { %v504_v22 = vadd.f32 %v503_v18, %v502_v14  ;;  %v271_v27 = vadd.f32 %v270_v24, %v269_v23 }
 0x731   :  { %1706 = vrcp.f32 %v504_v22  ;;  %v272_v31 = vrot.slane %v271_v27, 1 }
 0x733   :  { %v273_v35 = vadd.f32 %v272_v31, %v271_v27 }
 0x73b   :  { %v1707_v28 = vpop.eup %1706 }
 0x73c   :  { %v506_v30 = vmul.f32 %v1707_v28, %v497_v0 }
 0x73e   :  { %509 = vperm.xlu0 %1679, %v506_v30  }
 0x742   :  { %303 = vrot.lane.b32.xlu0 %v273_v35, %s1774_s17 }
 0x757   :  { %v792_v38 = vpop.permute.xlu0 %791 }
 0x758   :  { %v1994_v39 = vadd.f32 %v792_v38, %v784_v37 }
 0x75a   :  { %1708 = vtanh.f32 %v1994_v39 }
 0x764   :  { %v1709_v40 = vpop.eup %1708 }
 0x765   :  { %797 = vrot.lane.b32.xlu1 %v1709_v40, %s1773_s16 }
 0x769   :  { %548 = vrot.lane.b32.xlu1 %v1921_v15, %s1774_s17 }
 0x7bd   :  { %v510_v41 = vpop.permute.xlu0 %509 }
 0x7be   :  { %v512_v42 = vmul.f32 %v510_v41, %v1865_v21 }
 0x7c0   :  { %v513_v43 = vsel %vm41_vm0, %v512_v42, 0.0 }
 0x7c1   :  { %v514_v61 = vrot.slane %v513_v43, 4  ;;  %v304_v44 = vpop.permute.xlu0 %303 }
 0x7c2   :  { %v306_v45 = vsel %vm153_vm1, %v1888_v46, %v304_v44  ;;  %v1035_v44 = vrot.slane %v1994_v39, 7 }
 0x7c3   :  { %v515_v47 = vadd.f32 %v514_v61, %v513_v43  ;;  %1520 = vmatmul.mubr.msk.f32.vlgmr.msra.gmra.mrb[6].mxu0 %vm307_vm7, %v306_v45 }
 0x7c4   :  { %1613 = vmatpush3.bf16.msra.mxu0 %v1955_v58  ;;  %1534 = vmatprep.mubr.msk.f32.mxu0 %vm1777_vm6, %v1772_v3 }
 0x7c5   :  { %v516_v15 = vrot.slane %v515_v47, 2  ;;  %1614 = vmatprep.subr.bf16.mxu0 %v1776_v57 }
 0x7c7   :  { %v517_v48 = vadd.f32 %v516_v15, %v515_v47 }
 0x7c8   :  { %1616 = vmatpush3.bf16.msra.mxu0 %v1962_v60 }
 0x7c9   :  { %v518_v49 = vrot.slane %v517_v48, 1  ;;  %1617 = vmatprep.subr.bf16.mxu0 %v1776_v57 }
 0x7cb   :  { %v519_v50 = vadd.f32 %v518_v49, %v517_v48 }
 0x7cc   :  { %1619 = vmatpush3.bf16.msra.mxu0 %v1981_v34 }
 0x7cd   :  { %552 = vrot.lane.b32.xlu0 %v519_v50, %s1774_s17  ;;  %1638 = vmatprep.subr.bf16.mxu0 %v1819_v8  ;;  %v748_v8 = vsel %vm242_vm3, %v747_v62, 0.0 }
 0x7d7   :  { %v798_v46 = vpop.permute.xlu1 %797 }
 0x7d8   :  { %v2015_v52 = vmul.f32 %v1941_v51, %v798_v46 }
 0x7da   :  { %v912_v53 = vrot.slane %v2015_v52, 2 }
 0x7db   :  { %v549_v0 = vpop.permute.xlu1 %548 }
 0x7dc   :  { %913 = vrot.lane.b32.xlu1 %v912_v53, %s1774_s17 }
 0x800   :  { %749 = vadd.xlane.f32.xlu1 %v748_v8 }
 0x83f   :  { %v553_v51 = vpop.permute.xlu0 %552 }
 0x840   :  { %v555_v1 = vsel %vm153_vm1, %v549_v0, %v553_v51 }
 0x841   :  { %v557_v5 = vrot.slane %v555_v1, 1 }
 0x843   :  { %1535 = vmatmul.mubr.msk.f32.vlgmr.msra.gmra.mrb[8].mxu0 %vm307_vm7, %v557_v5 }
 0x844   :  { %1640 = vmatpush1.bf16.msra.mxu0 %v1827_v12  ;;  %981 = vmatprep.mubr.f32.mxu0 %v1772_v3 }
 0x845   :  { %1642 = vmatprep.subr.bf16.mxu0 %v1839_v16 }
 0x848   :  { %1644 = vmatpush1.bf16.msra.mxu0 %v1848_v19 }
 0x849   :  { %1645 = vmatprep.subr.bf16.mxu0 %v1776_v57 }
 0x84e   :  { %v914_v26 = vpop.permute.xlu1 %913 }
 0x84f   :  { %1464 = vmatmul.mubr.msk.f32.vlgmr.msra.gmra.mrb[10].mxu0 %vm153_vm1, %v914_v26 }
 0x850   :  { %1647 = vmatpush3.bf16.msra.mxu0 %v1955_v58  ;;  %1564 = vmatprep.mubr.msk.f32.mxu0 %vm1777_vm6, %v1772_v3 }
 0x851   :  { %1648 = vmatprep.subr.bf16.mxu0 %v1776_v57 }
 0x854   :  { %1650 = vmatpush3.bf16.msra.mxu0 %v1962_v60 }
 0x855   :  { %1651 = vmatprep.subr.bf16.mxu0 %v1776_v57 }
 0x858   :  { %1653 = vmatpush3.bf16.msra.mxu0 %v1981_v34 }
 0x88d   :  { %v750_v23 = vpop.xlane.xlu1 %749 }
 0x88e   :  { %v751_v24 = vadd.f32 %v1933_v29, %v750_v23 }
 0x890   :  { %v752_v27 = vsel %vm251_vm4, %v751_v24, 0.0 }
 0x891   :  { %v753_v28 = vrot.slane %v752_v27, 4 }
 0x893   :  { %v754_v31 = vadd.f32 %v753_v28, %v752_v27 }
 0x895   :  { %v755_v32 = vrot.slane %v754_v31, 2 }
 0x896   :  { %v2039_v6 = vpop.f32.mrb[6].mxu0 }
 0x897   :  { %v1521_v7 = vpop.f32.mrb[7].mxu0  ;;  %v756_v33 = vadd.f32 %v755_v32, %v754_v31 }
 0x899   :  { %v757_v36 = vrot.slane %v756_v33, 1 }
 0x89b   :  { %v758_v38 = vadd.f32 %v757_v36, %v756_v33 }
 0x916   :  { %v2041_v10 = vpop.f32.mrb[8].mxu0 }
 0x917   :  { %v1536_v11 = vpop.f32.mrb[9].mxu0 }
 0x922   :  { %v983_v13 = vpop.f32.mrb[10].mxu0 }
 0x923   :  { %v989_v14 = vrot.slane %v983_v13, 5  ;;  %v2043_v17 = vpop.f32.mrb[11].mxu0 }
 0x924   :  { %v995_v23 = vrot.slane %v2043_v17, %v1907_v2 }
 0x925   :  { %v991_v18 = vadd.f32 %v989_v14, %v1879_v25 }
 0x927   :  { %1710 = vtanh.f32 %v991_v18  ;;  %v1465_v30 = vmul.f32 -1.442695, %v991_v18 }
 0x929   :  { %1712 = vpow2.f32 %v1465_v30 }
 0x931   :  { %v1711_v22 = vpop.eup %1710 }
 0x932   :  { %1039 = vrot.lane.b32.xlu0 %v1711_v22, %s1773_s16 }
 0x933   :  { %v1713_v35 = vpop.eup %1712 }
 0x934   :  { %v1030_v37 = vadd.f32 1.0, %v1713_v35 }
 0x936   :  { %1714 = vrcp.f32 %v1030_v37 }
 0x937   :  { %1716 = vrcp.f32 %v758_v38 }
 0x940   :  { %v1715_v40 = vpop.eup %1714 }
 0x941   :  { %v1717_v43 = vpop.eup %1716  ;;  %v1037_v45 = vmul.f32 %v1715_v40, %v1035_v44 }
 0x942   :  { %v760_v61 = vmul.f32 %v1717_v43, %v751_v24  ;;  %v996_v24 = vadd.f32 %v995_v23, %v1909_v4 }
 0x944   :  { %vm997_vm10 = vcmp.gt.f32.partialorder %v996_v24, 0.0 }
 0x9a4   :  { %v1040_v41 = vpop.permute.xlu0 %1039 }
 0x9a5   :  { %v1042_v42 = vmul.f32 %v1715_v40, %v1040_v41 }
 0x9a7   :  { %1044 = vrot.lane.b32.xlu0 %v1042_v42, %s1774_s17 }
 0x9ab   :  { %763 = vperm.xlu0 %1679, %v760_v61  }
 0xa19   :  { %v1045_v47 = vpop.permute.xlu0 %1044 }
 0xa1a   :  { %v2051_v15 = vadd.f32 %v1045_v47, %v1037_v45 }
 0xa1c   :  { %1718 = vtanh.f32 %v2051_v15 }
 0xa26   :  { %v1719_v48 = vpop.eup %1718 }
 0xa27   :  { %1050 = vrot.lane.b32.xlu0 %v1719_v48, %s1773_s16 }
 0xa2a   :  { %v764_v49 = vpop.permute.xlu0 %763 }
 0xa2b   :  { %v766_v50 = vmul.f32 %v764_v49, %v1865_v21  ;;  %802 = vrot.lane.b32.xlu0 %v2015_v52, %s1774_s17 }
 0xa2d   :  { %v767_v46 = vsel %vm41_vm0, %v766_v50, 0.0 }
 0xa2e   :  { %v768_v53 = vrot.slane %v767_v46, 4 }
 0xa30   :  { %v769_v54 = vadd.f32 %v768_v53, %v767_v46 }
 0xa32   :  { %v770_v39 = vrot.slane %v769_v54, 2 }
 0xa34   :  { %v771_v55 = vadd.f32 %v770_v39, %v769_v54 }
 0xa36   :  { %v772_v56 = vrot.slane %v771_v55, 1 }
 0xa38   :  { %v773_v59 = vadd.f32 %v772_v56, %v771_v55 }
 0xa3a   :  { %806 = vrot.lane.b32.xlu0 %v773_v59, %s1774_s17 }
 0xa99   :  { %v1051_v62 = vpop.permute.xlu0 %1050 }
 0xa9a   :  { %v2060_v8 = vmul.f32 %v1715_v40, %v1051_v62 }
 0xa9c   :  { %v1165_v0 = vrot.slane %v2060_v8, 3 }
 0xa9d   :  { %v803_v51 = vpop.permute.xlu0 %802 }
 0xa9e   :  { %1166 = vrot.lane.b32.xlu0 %v1165_v0, %s1774_s17 }
 0xaac   :  { %v807_v1 = vpop.permute.xlu0 %806 }
 0xaad   :  { %v809_v52 = vsel %vm153_vm1, %v803_v51, %v807_v1  ;;  %v2104_v1 = vld [vmem:[%s2166_s2 + $0x2] sm:$0x1] }
 0xaae   :  { %v811_v5 = vrot.slane %v809_v52, 2  ;;  %v388_v52 = vadd.f32 %v2039_v6, %v2104_v1 }
 0xab0   :  { %1550 = vmatmul.mubr.msk.f32.vlgmr.msra.gmra.mrb[6].mxu1 %vm307_vm7, %v811_v5 }
 0xab1   :  { %1657 = vmatpush1.bf16.msra.mxu1 %v1827_v12  ;;  %1234 = vmatprep.mubr.f32.mxu1 %v1772_v3 }
 0xab2   :  { %1659 = vmatprep.subr.bf16.mxu1 %v1839_v16 }
 0xab5   :  { %1661 = vmatpush1.bf16.msra.mxu1 %v1848_v19 }
 0xab6   :  { %1662 = vmatprep.subr.bf16.mxu1 %v1776_v57 }
 0xb10   :  { %v1167_v26 = vpop.permute.xlu0 %1166 }
 0xb11   :  { %1468 = vmatmul.mubr.msk.f32.vlgmr.msra.gmra.mrb[8].mxu1 %vm153_vm1, %v1167_v26 }
 0xb12   :  { %1664 = vmatpush3.bf16.msra.mxu1 %v1955_v58  ;;  %1579 = vmatprep.mubr.msk.f32.mxu1 %vm1777_vm6, %v1772_v3 }
 0xb13   :  { %1665 = vmatprep.subr.bf16.mxu1 %v1776_v57 }
 0xb16   :  { %1667 = vmatpush3.bf16.msra.mxu1 %v1962_v60 }
 0xb17   :  { %1668 = vmatprep.subr.bf16.mxu1 %v1776_v57 }
 0xb1a   :  { %1670 = vmatpush3.bf16.msra.mxu1 %v1981_v34 }
 0xb83   :  { %v2079_v12 = vpop.f32.mrb[6].mxu1 }
 0xb84   :  { %v1551_v16 = vpop.f32.mrb[7].mxu1 }
 0xbe4   :  { %v1236_v19 = vpop.f32.mrb[8].mxu1 }
 0xbe5   :  { %v1242_v7 = vrot.slane %v1236_v19, 4  ;;  %v1238_v11 = vpop.f32.mrb[9].mxu1 }
 0xbe6   :  { %v1248_v13 = vrot.slane %v1238_v11, %v1907_v2 }
 0xbe7   :  { %v1244_v58 = vadd.f32 %v1242_v7, %v1879_v25  ;;  %v998_v25 = vmul.f32 0.01, %v996_v24 }
 0xbe8   :  { %v1249_v14 = vadd.f32 %v1248_v13, %v1909_v4 }
 0xbe9   :  { %1720 = vtanh.f32 %v1244_v58  ;;  %v999_v27 = vsel %vm997_vm10, %v996_v24, %v998_v25  ;;  %v1469_v31 = vmul.f32 -1.442695, %v1244_v58 }
 0xbea   :  { %v1251_v18 = vmul.f32 0.01, %v1249_v14  ;;  %vm1250_vm9 = vcmp.gt.f32.partialorder %v1249_v14, 0.0  ;;  %v1000_v28 = vmul.f32 %v1917_v9, %v999_v27 }
 0xbeb   :  { %1722 = vpow2.f32 %v1469_v31 }
 0xbec   :  { %v1252_v60 = vsel %vm1250_vm9, %v1249_v14, %v1251_v18  ;;  %v1001_v30 = vsel %vm242_vm3, %v1000_v28, 0.0 }
 0xbed   :  { %v1253_v57 = vmul.f32 %v1917_v9, %v1252_v60 }
 0xbef   :  { %v1254_v34 = vsel %vm242_vm3, %v1253_v57, 0.0 }
 0xbf0   :  { %1255 = vadd.xlane.f32.xlu1 %v1254_v34 }
 0xbf3   :  { %v1721_v22 = vpop.eup %1720 }
 0xbf4   :  { %1292 = vrot.lane.b32.xlu0 %v1721_v22, %s1773_s16 }
 0xbf5   :  { %v1723_v32 = vpop.eup %1722 }
 0xbf6   :  { %v1283_v33 = vadd.f32 1.0, %v1723_v32  ;;  %v893_v32 = vadd.f32 %v2079_v12, %v2104_v1 }
 0xbf8   :  { %1724 = vrcp.f32 %v1283_v33  ;;  %v894_v33 = vsel %vm389_vm11, %v893_v32, -inf }
 0xc02   :  { %v1725_v35 = vpop.eup %1724 }
 0xc13   :  { %1002 = vadd.xlane.f32.xlu0 %v1001_v30 }
 0xc66   :  { %v1293_v36 = vpop.permute.xlu0 %1292 }
 0xc67   :  { %v1295_v37 = vmul.f32 %v1725_v35, %v1293_v36 }
 0xc69   :  { %1297 = vrot.lane.b32.xlu1 %v1295_v37, %s1774_s17 }
 0xc7d   :  { %v1256_v2 = vpop.xlane.xlu1 %1255 }
 0xc7e   :  { %v1257_v4 = vadd.f32 %v1933_v29, %v1256_v2 }
 0xc80   :  { %v1258_v17 = vsel %vm251_vm4, %v1257_v4, 0.0 }
 0xc81   :  { %v1259_v38 = vrot.slane %v1258_v17, 4 }
 0xc83   :  { %v1260_v9 = vadd.f32 %v1259_v38, %v1258_v17 }
 0xc85   :  { %v1261_v42 = vrot.slane %v1260_v9, 2 }
 0xc87   :  { %v1262_v44 = vadd.f32 %v1261_v42, %v1260_v9 }
 0xc89   :  { %v1263_v48 = vrot.slane %v1262_v44, 1 }
 0xc8b   :  { %v1264_v46 = vadd.f32 %v1263_v48, %v1262_v44 }
 0xca0   :  { %v1003_v40 = vpop.xlane.xlu0 %1002 }
 0xca1   :  { %v1004_v41 = vadd.f32 %v1933_v29, %v1003_v40  ;;  %v1288_v29 = vrot.slane %v2051_v15, 7 }
 0xca3   :  { %v1005_v43 = vsel %vm251_vm4, %v1004_v41, 0.0  ;;  %v1290_v59 = vmul.f32 %v1725_v35, %v1288_v29 }
 0xca4   :  { %v1006_v61 = vrot.slane %v1005_v43, 4 }
 0xca6   :  { %v1007_v45 = vadd.f32 %v1006_v61, %v1005_v43 }
 0xca8   :  { %v1008_v47 = vrot.slane %v1007_v45, 2 }
 0xcaa   :  { %v1009_v49 = vadd.f32 %v1008_v47, %v1007_v45 }
 0xcac   :  { %v1010_v50 = vrot.slane %v1009_v49, 1 }
 0xcae   :  { %v1011_v53 = vadd.f32 %v1010_v50, %v1009_v49 }
 0xcb0   :  { %1726 = vrcp.f32 %v1011_v53 }
 0xcb1   :  { %1728 = vrcp.f32 %v1264_v46 }
 0xcba   :  { %v1727_v54 = vpop.eup %1726 }
 0xcbb   :  { %v1013_v39 = vmul.f32 %v1727_v54, %v1004_v41  ;;  %v1729_v55 = vpop.eup %1728 }
 0xcbc   :  { %v1266_v56 = vmul.f32 %v1729_v55, %v1257_v4  ;;  %v640_v4 = vadd.f32 %v2041_v10, %v2104_v1 }
 0xcbd   :  { %1016 = vperm.xlu1 %1678, %v1013_v39   ;;  %v1778_v39 = vmov 10  }
 0xcbe   :  { %v641_v17 = vsel %vm389_vm11, %v640_v4, -inf  ;;  %1680 = vset.pattern.permute.xlu0 %v1778_v39 }
 0xcc1   :  { %1269 = vperm.xlu1 %1678, %v1266_v56  }
 0xcc5   :  { %1055 = vrot.lane.b32.xlu1 %v2060_v8, %s1774_s17  ;;  %v390_v8 = vsel %vm389_vm11, %v388_v52, -inf }
 0xcc6   :  { %1681 = vset.pattern.permute.xlu1 %v1778_v39 }
 0xcdb   :  { %v1298_v62 = vpop.permute.xlu1 %1297 }
 0xcdc   :  { %v1300_v0 = vadd.f32 %v1298_v62, %v1290_v59 }
 0xcde   :  { %1730 = vtanh.f32 %v1300_v0 }
 0xce8   :  { %v1731_v51 = vpop.eup %1730 }
 0xce9   :  { %1303 = vrot.lane.b32.xlu0 %v1731_v51, %s1773_s16 }
 0xd08   :  { %391 = vmax.xlane.f32.xlu0 %v390_v8 }
 0xd3c   :  { %v1017_v15 = vpop.permute.xlu1 %1016 }
 0xd3d   :  { %v1019_v5 = vmul.f32 %v1017_v15, %v1865_v21 }
 0xd3f   :  { %v1020_v26 = vsel %vm41_vm0, %v1019_v5, 0.0 }
 0xd40   :  { %v1021_v16 = vrot.slane %v1020_v26, 4  ;;  %v1270_v7 = vpop.permute.xlu1 %1269 }
 0xd41   :  { %v1272_v13 = vmul.f32 %v1270_v7, %v1865_v21  ;;  %v1449_v21 = vld [vmem:[%s2166_s2 + $0x3] ss:$0 sm:$0xff] }
 0xd42   :  { %v1022_v19 = vadd.f32 %v1021_v16, %v1020_v26  ;;  %v144_v30 = vmul.f32 %v1449_v21, %v1856_v20 }
 0xd43   :  { %v1273_v18 = vsel %vm41_vm0, %v1272_v13, 0.0 }
 0xd44   :  { %v1023_v11 = vrot.slane %v1022_v19, 2  ;;  %v1274_v57 = vrot.slane %v1273_v18, 4  ;;  %v145_v31 = vsel %vm41_vm0, %v144_v30, 0.0  ;;  %v1056_v38 = vpop.permute.xlu1 %1055  ;;  %vm1437_vm0 = vcmask 1044480  }
 0xd46   :  { %v1024_v58 = vadd.f32 %v1023_v11, %v1022_v19  ;;  %v1275_v34 = vadd.f32 %v1274_v57, %v1273_v18 }
 0xd48   :  { %v1025_v14 = vrot.slane %v1024_v58, 1  ;;  %v1276_v22 = vrot.slane %v1275_v34, 2 }
 0xd4a   :  { %v1026_v60 = vadd.f32 %v1025_v14, %v1024_v58  ;;  %v1277_v23 = vadd.f32 %v1276_v22, %v1275_v34 }
 0xd4c   :  { %1059 = vrot.lane.b32.xlu1 %v1026_v60, %s1774_s17  ;;  %v1278_v27 = vrot.slane %v1277_v23, 1 }
 0xd4e   :  { %v1279_v28 = vadd.f32 %v1278_v27, %v1277_v23 }
 0xd5b   :  { %v1304_v24 = vpop.permute.xlu0 %1303 }
 0xd5c   :  { %v1306_v25 = vmul.f32 %v1725_v35, %v1304_v24 }
 0xd5e   :  { %1308 = vrot.lane.b32.xlu1 %v1306_v25, %s1774_s17 }
 0xd62   :  { %1312 = vrot.lane.b32.xlu1 %v1279_v28, %s1774_s17 }
 0xd86   :  { %146 = vadd.xlane.f32.xlu1 %v145_v31 }
 0xd8a   :  { %895 = vmax.xlane.f32.xlu1 %v894_v33 }
 0xd95   :  { %v392_v35 = vpop.xlane.xlu0 %391 }
 0xd96   :  { %v393_v36 = vsub.f32 %v388_v52, %v392_v35 }
 0xd98   :  { %v394_v37 = vmul.f32 1.442695, %v393_v36 }
 0xd9a   :  { %1732 = vpow2.f32 %v394_v37 }
 0xda4   :  { %v2124_v2 = vpop.eup %1732 }
 0xda5   :  { %v396_v20 = vsel %vm389_vm11, %v2124_v2, 0.0 }
 0xda6   :  { %397 = vadd.xlane.f32.xlu0 %v396_v20 }
 0xdaa   :  { %642 = vmax.xlane.f32.xlu0 %v641_v17 }
 0xdbe   :  { %v1060_v9 = vpop.permute.xlu1 %1059 }
 0xdbf   :  { %v1062_v40 = vsel %vm153_vm1, %v1056_v38, %v1060_v9 }
 0xdc0   :  { %v1064_v41 = vrot.slane %v1062_v40, 3 }
 0xdc2   :  { %1565 = vmatmul.mubr.msk.f32.vlgmr.msra.gmra.mrb[12].mxu0 %vm307_vm7, %v1064_v41 }
 0xdd0   :  { %v1309_v42 = vpop.permute.xlu1 %1308 }
 0xdd4   :  { %v1313_v43 = vpop.permute.xlu1 %1312 }
 0xdd5   :  { %v1315_v61 = vsel %vm153_vm1, %v1309_v42, %v1313_v43 }
 0xdd6   :  { %v1317_v44 = vrot.slane %v1315_v61, 4 }
 0xdd8   :  { %1580 = vmatmul.mubr.msk.f32.vlgmr.msra.gmra.mrb[10].mxu1 %vm307_vm7, %v1317_v44 }
 0xe13   :  { %v147_v45 = vpop.xlane.xlu1 %146 }
 0xe14   :  { %v381_v47 = vadd.f32 %v2039_v6, %v147_v45  ;;  %v884_v48 = vrot.slane %v147_v45, 2  ;;  %v631_v15 = vrot.slane %v147_v45, 1  ;;  %v1137_v26 = vrot.slane %v147_v45, 3 }
 0xe15   :  { %v1390_v7 = vrot.slane %v147_v45, 4 }
 0xe16   :  { %v886_v49 = vadd.f32 %v884_v48, %v2079_v12  ;;  %v633_v5 = vadd.f32 %v631_v15, %v2041_v10  ;;  %v1455_v28 = vmul.f32 -1.442695, %v381_v47 }
 0xe17   :  { %v896_v29 = vpop.xlane.xlu1 %895 }
 0xe18   :  { %v897_v6 = vsub.f32 %v893_v32, %v896_v29  ;;  %v1459_v16 = vmul.f32 -1.442695, %v633_v5 }
 0xe1a   :  { %v898_v59 = vmul.f32 1.442695, %v897_v6 }
 0xe33   :  { %v2137_v50 = vpop.xlane.xlu0 %397 }
 0xe37   :  { %v643_v46 = vpop.xlane.xlu0 %642 }
 0xe38   :  { %v644_v53 = vsub.f32 %v640_v4, %v643_v46 }
 0xe3a   :  { %v645_v54 = vmul.f32 1.442695, %v644_v53 }
 0xe3c   :  { %1734 = vpow2.f32 %v645_v54 }
 0xe3d   :  { %1736 = vpow2.f32 %v898_v59 }
 0xe3e   :  { %1738 = vpow2.f32 %v1459_v16 }
 0xe46   :  { %v2139_v55 = vpop.eup %1734 }
 0xe47   :  { %v647_v56 = vsel %vm389_vm11, %v2139_v55, 0.0  ;;  %v2145_v52 = vpop.eup %1736 }
 0xe48   :  { %648 = vadd.xlane.f32.xlu0 %v647_v56  ;;  %v900_v8 = vsel %vm389_vm11, %v2145_v52, 0.0  ;;  %v1739_v57 = vpop.eup %1738 }
 0xe49   :  { %v637_v34 = vadd.f32 1.0, %v1739_v57 }
 0xe95   :  { %v1133_v12 = vpop.f32.mrb[12].mxu0 }
 0xe96   :  { %v1146_v62 = vadd.f32 %v1133_v12, %v2104_v1  ;;  %v1566_v0 = vpop.f32.mrb[13].mxu0  ;;  %v1139_v19 = vadd.f32 %v1137_v26, %v1133_v12 }
 0xe98   :  { %v1147_v51 = vsel %vm389_vm11, %v1146_v62, -inf  ;;  %v1467_v11 = vmul.f32 -1.442695, %v1139_v19 }
 0xe99   :  { %1148 = vmax.xlane.f32.xlu1 %v1147_v51 }
 0xe9a   :  { %1740 = vpow2.f32 %v1467_v11 }
 0xe9b   :  { %1742 = vrcp.f32 %v637_v34 }
 0xe9d   :  { %901 = vadd.xlane.f32.xlu1 %v900_v8 }
 0xea4   :  { %v1741_v22 = vpop.eup %1740 }
 0xea5   :  { %v1143_v10 = vadd.f32 1.0, %v1741_v22  ;;  %v1743_v23 = vpop.eup %1742 }
 0xea7   :  { %1744 = vrcp.f32 %v1143_v10 }
 0xeab   :  { %v1386_v13 = vpop.f32.mrb[10].mxu1 }
 0xeac   :  { %v1392_v58 = vadd.f32 %v1390_v7, %v1386_v13  ;;  %v1399_v14 = vadd.f32 %v1386_v13, %v2104_v1  ;;  %v1581_v18 = vpop.f32.mrb[11].mxu1  ;;  %v1463_v1 = vmul.f32 -1.442695, %v886_v49  ;;  %v149_v49 = vand.u32 127, %v148_v63 }
 0xeae   :  { %v1400_v60 = vsel %vm389_vm11, %v1399_v14, -inf  ;;  %v1471_v30 = vmul.f32 -1.442695, %v1392_v58  ;;  %vm150_vm12 = vcmp.eq.s32.totalorder %v149_v49, 10 }
 0xeaf   :  { %1401 = vmax.xlane.f32.xlu0 %v1400_v60  ;;  %v1450_v29 = vsel %vm150_vm12, 1.0, %v1772_v3 }
 0xeb1   :  { %v1745_v24 = vpop.eup %1744 }
 0xec5   :  { %654 = vperm.xlu0 %1680, %v1743_v23  }
 0xec9   :  { %1160 = vperm.xlu0 %1680, %v1745_v24  }
 0xed5   :  { %v649_v35 = vpop.xlane.xlu0 %648 }
 0xf26   :  { %v1149_v25 = vpop.xlane.xlu1 %1148 }
 0xf27   :  { %v1150_v27 = vsub.f32 %v1146_v62, %v1149_v25 }
 0xf29   :  { %v1151_v21 = vmul.f32 1.442695, %v1150_v27 }
 0xf2a   :  { %v902_v45 = vpop.xlane.xlu1 %901 }
 0xf2b   :  { %1746 = vpow2.f32 %v1151_v21 }
 0xf2c   :  { %1748 = vpow2.f32 %v1455_v28 }
 0xf2d   :  { %1750 = vpow2.f32 %v1463_v1 }
 0xf2e   :  { %1752 = vpow2.f32 %v1471_v30 }
 0xf35   :  { %v1747_v31 = vpop.eup %1746 }
 0xf36   :  { %v1749_v32 = vpop.eup %1748  ;;  %v1153_v33 = vsel %vm389_vm11, %v1747_v31, 0.0 }
 0xf37   :  { %1154 = vadd.xlane.f32.xlu1 %v1153_v33  ;;  %v1751_v36 = vpop.eup %1750  ;;  %v385_v37 = vadd.f32 1.0, %v1749_v32 }
 0xf38   :  { %v890_v4 = vadd.f32 1.0, %v1751_v36  ;;  %v1753_v38 = vpop.eup %1752 }
 0xf39   :  { %1754 = vrcp.f32 %v385_v37  ;;  %v1396_v40 = vadd.f32 1.0, %v1753_v38 }
 0xf3a   :  { %1756 = vrcp.f32 %v890_v4 }
 0xf3c   :  { %v1402_v20 = vpop.xlane.xlu0 %1401 }
 0xf3d   :  { %v1403_v17 = vsub.f32 %v1399_v14, %v1402_v20 }
 0xf3f   :  { %v1404_v9 = vmul.f32 1.442695, %v1403_v17 }
 0xf41   :  { %1758 = vpow2.f32 %v1404_v9 }
 0xf42   :  { %1760 = vrcp.f32 %v1396_v40 }
 0xf43   :  { %v1755_v41 = vpop.eup %1754 }
 0xf44   :  { %v1757_v42 = vpop.eup %1756  ;;  %v655_v48 = vpop.permute.xlu0 %654 }
 0xf45   :  { %v657_v62 = vmul.f32 %v1450_v29, %v655_v48 }
 0xf48   :  { %403 = vperm.xlu1 %1681, %v1755_v41   ;;  %v1161_v53 = vpop.permute.xlu0 %1160 }
 0xf49   :  { %v1163_v15 = vmul.f32 %v1450_v29, %v1161_v53 }
 0xf4b   :  { %v1759_v43 = vpop.eup %1758 }
 0xf4c   :  { %907 = vperm.xlu1 %1681, %v1757_v42   ;;  %v1406_v61 = vsel %vm389_vm11, %v1759_v43, 0.0  ;;  %v1761_v44 = vpop.eup %1760 }
 0xf4d   :  { %1407 = vadd.xlane.f32.xlu0 %v1406_v61 }
 0xf50   :  { %1413 = vperm.xlu1 %1681, %v1761_v44  }
 0xfc4   :  { %v1155_v47 = vpop.xlane.xlu1 %1154 }
 0xfc5   :  { %1762 = vrcp.f32 %v1155_v47 }
 0xfc6   :  { %1764 = vrcp.f32 %v902_v45 }
 0xfc7   :  { %1766 = vrcp.f32 %v649_v35 }
 0xfc8   :  { %v404_v46 = vpop.permute.xlu1 %403  ;;  %1768 = vrcp.f32 %v2137_v50 }
 0xfc9   :  { %v406_v50 = vmul.f32 %v1450_v29, %v404_v46 }
 0xfcc   :  { %v908_v39 = vpop.permute.xlu1 %907 }
 0xfcd   :  { %v910_v12 = vmul.f32 %v1450_v29, %v908_v39 }
 0xfcf   :  { %v1763_v56 = vpop.eup %1762 }
 0xfd0   :  { %v1765_v6 = vpop.eup %1764  ;;  %v1157_v0 = vmul.f32 %v1763_v56, %v1747_v31  ;;  %v1414_v7 = vpop.permute.xlu1 %1413 }
 0xfd1   :  { %v1767_v59 = vpop.eup %1766  ;;  %v904_v8 = vmul.f32 %v1765_v6, %v2145_v52  ;;  %v1416_v58 = vmul.f32 %v1450_v29, %v1414_v7 }
 0xfd2   :  { %v1769_v51 = vpop.eup %1768  ;;  %v651_v63 = vmul.f32 %v1767_v59, %v2139_v55  ;;  %v1164_v16 = vadd.f32 %v1163_v15, %v1157_v0 }
 0xfd3   :  { %v911_v5 = vadd.f32 %v910_v12, %v904_v8  ;;  %v400_v19 = vmul.f32 %v1769_v51, %v2124_v2 }
 0xfd4   :  { %v658_v26 = vadd.f32 %v657_v62, %v651_v63  ;;  %v1425_v60 = vrot.slane %v1164_v16, 5 }
 0xfd5   :  { %v407_v3 = vadd.f32 %v406_v50, %v400_v19  ;;  %v1422_v13 = vrot.slane %v911_v5, 6 }
 0xfd6   :  { %v1419_v18 = vrot.slane %v658_v26, 7 }
 0xfd8   :  { %v1430_v55 = vsel %vm389_vm11, %v407_v3, %v1419_v18 }
 0xfd9   :  { %v1432_v57 = vsel %vm1431_vm13, %v1430_v55, %v1422_v13 }
 0xfda   :  { %v1408_v54 = vpop.xlane.xlu0 %1407  ;;  %v1434_v22 = vsel %vm1433_vm14, %v1432_v57, %v1425_v60 }
 0xfdb   :  { %1770 = vrcp.f32 %v1408_v54 }
 0xfe5   :  { %v1771_v11 = vpop.eup %1770 }
 0xfe6   :  { %v1410_v14 = vmul.f32 %v1771_v11, %v1759_v43 }
 0xfe8   :  { %v1417_v52 = vadd.f32 %v1416_v58, %v1410_v14 }
 0xfea   :  { %v1428_v34 = vrot.slane %v1417_v52, 4 }
 0xfec   :  { %v1436_v10 = vsel %vm1435_vm15, %v1434_v22, %v1428_v34 }
 0xfed   :  { %v1438_v2 = vsel %vm1437_vm0, %v1436_v10, 0.0 }
 0xfee   :  { %1439 = vst [vmem:[%s2167_s3] sm:$0xff] %v1438_v2 }

</bundles_post_ra>
